<compile_context>
chip_gen: v5e
topology: v5e:2x2
jax: 0.10.0
libtpu: 0.0.40
codegen_flags: <defaults>
</compile_context>

<pallas_src>
import math
import functools

import numpy as np
import jax
import jax.numpy as jnp
from jax import lax
from jax.experimental import pallas as pl
from jax.experimental.pallas import tpu as pltpu

HIDDEN = 128          # d_model
HEAD = 8              # number of attention heads
D_K = HIDDEN // HEAD  # per-head key dim
D_V = HIDDEN // HEAD  # per-head value dim
LN_EPS = 1e-5         # torch.nn.LayerNorm default eps
MAX_B_BLK = 8         # cap on batches per grid step (bounds vreg/VMEM working set)


def _ceil_div(a, b):
    return -(-a // b)


def _tensorcores_per_chip():
    """1 for single-TC v5e/v6e; 2 for v7x.  Best-effort detection."""
    try:
        kind = jax.devices()[0].device_kind.lower()
    except Exception:
        return 1
    return 2 if ("v7" in kind or "tpu7" in kind) else 1


def _choose_blocking(bs, L, P):
    """Generation-aware batch blocking.

    Single-TC chips (v5e/v6e): one grid step for the whole batch — the ~0.35us
    fixed per-step cost + extra writeback wave is a double-digit % of wall
    clock here and a second step buys zero parallelism.
    v7x (2 TCs/chip): >=2 equal "parallel" steps so both cores get work; bs is
    padded up so the steps are balanced (never many tiny serial-ish steps).
    Returns (b_blk, n_steps, bs_padded).
    """
    min_steps = 2 if (_tensorcores_per_chip() >= 2 and bs >= 2) else 1
    n_steps = max(min_steps, _ceil_div(bs, MAX_B_BLK))
    b_blk = _ceil_div(bs, n_steps)
    # (8,128) rule on the 2-D output blocks: fall back to one full-array step
    # if per-step row counts would not be sublane aligned.
    if n_steps > 1 and ((b_blk * L) % 8 or (b_blk * P) % 8):
        return bs, 1, bs
    return b_blk, n_steps, n_steps * b_blk


def _contra_kernel(lang_ref, obj_ref, w_ref, vec_ref, const_ref,
                   ori_ref, out_ref, attw_ref,
                   q_scr, kv_scr, ctx_scr,
                   *, b_blk, n_head, L, P, D, P_pad):
    HP = n_head * P
    f32 = jnp.float32

    # ---- max-pool over description length, one batch at a time ---------------
    # Bounds the live range to ~L*T*D; pooled features go straight into the
    # ori_lang_feat output block and are read back for Q / residual.
    for b in range(b_blk):
        lang_b = lang_ref[pl.ds(b * L, L), :, :]                     # (L, T, D)
        ori_ref[pl.ds(b * L, L), :] = jnp.max(lang_b, axis=1).astype(ori_ref.dtype)

    # ---- packed biases / LayerNorm vectors ------------------------------------
    b_q = vec_ref[0:1, 0:D]              # (1, D), pre-scaled by 1/sqrt(d_k)
    b_kv = vec_ref[0:1, D:3 * D]         # (1, 2D) = [bk | bv]
    b_o = vec_ref[0:1, 3 * D:4 * D]      # (1, D)
    gamma = vec_ref[1:2, 0:D]            # (1, D)
    beta = vec_ref[1:2, D:2 * D]         # (1, D)

    # ---- projections (split Q vs KV; results parked in VMEM scratch so no big
    #      SSA value stays live across the per-batch loop) ----------------------
    q_in = ori_ref[...].astype(f32)                                   # (nq, D)
    q_scr[...] = jnp.dot(q_in, w_ref[:, 0:D],
                         preferred_element_type=f32) + b_q            # (nq, D), pre-scaled
    kv_scr[...] = jnp.dot(obj_ref[...], w_ref[:, D:3 * D],
                          preferred_element_type=f32) + b_kv          # (nk, 2D)

    # ---- per-batch cross attention --------------------------------------------
    for b in range(b_blk):
        qb = q_scr[pl.ds(b * L, L), :]                                # (L, D)
        kvb = kv_scr[pl.ds(b * P, P), :]                              # (P, 2D)
        kb = kvb[:, 0:D]                                              # (P, D)
        vb = kvb[:, D:2 * D]                                          # (P, D)

        # block-diagonal head expansion (sublane tiles + constant mask; no lane ops)
        maskc = const_ref[:, 0:D]                                     # (HP, D)
        kh = jnp.concatenate([kb] * n_head, axis=0) * maskc           # (HP, D)
        vh = jnp.concatenate([vb] * n_head, axis=0) * maskc           # (HP, D)
        # Fused ctx/attw RHS: lane concat at a 128-lane boundary is free; one
        # matmul yields per-head contexts (first D lanes) and head-mean
        # attention weights (next P_pad lanes) -> fills the 256-wide MXU.
        vt = jnp.concatenate([vh, const_ref[:, D + HP:D + HP + P_pad]], axis=1)

        # All-head scores in one matmul; A.B^T (contract last dims) is the
        # standard flash-attention pattern (MXU transposed-rhs).
        # TODO(synk): confirm via pl.lower_as_mlir that no XLU transpose of kh
        #             is emitted; if it is, transpose kb (2 vregs) before the
        #             head expansion instead.
        s = lax.dot_general(qb, kh, (((1,), (1,)), ((), ())),
                            preferred_element_type=f32)               # (L, HP)
        s = s - jnp.max(s, axis=-1, keepdims=True)
        p = jnp.exp(s)

        # per-head softmax denominators broadcast over each head's lane block
        denom = jnp.dot(p, const_ref[:, D:D + HP],
                        preferred_element_type=f32)                   # (L, HP)
        denom = jnp.maximum(denom, 1e-30)     # fully-underflowed head block must
                                              # not turn into inf/NaN below
        inv = pl.reciprocal(denom, approx=True)
        inv = inv * (2.0 - denom * inv)       # one Newton step -> ~f32 accuracy
        att = p * inv                                                  # (L, HP)

        res = jnp.dot(att, vt, preferred_element_type=f32)            # (L, D + P_pad)
        ctx_scr[pl.ds(b * L, L), :] = res[:, 0:D]
        attw_ref[pl.ds(b * L, L), :] = res[:, D:D + P_pad].astype(attw_ref.dtype)

    # ---- output projection + residual + LayerNorm (dropout == identity) -------
    o = jnp.dot(ctx_scr[...], w_ref[:, 3 * D:4 * D],
                preferred_element_type=f32) + b_o                     # (nq, D)
    x = ori_ref[...].astype(f32) + o
    mu = jnp.mean(x, axis=-1, keepdims=True)
    xc = x - mu
    var = jnp.mean(xc * xc, axis=-1, keepdims=True)
    y = xc * lax.rsqrt(var + LN_EPS)
    out_ref[...] = (y * gamma + beta).astype(out_ref.dtype)


def _pack_params(params, d_k, P, P_pad):
    """Pack the 10 parameter tensors + structure constants into 3 operands."""
    wq, bq, wk, bk, wv, bv, wo, bo, gamma, beta = params
    D = wq.shape[0]
    scale = 1.0 / math.sqrt(d_k)                      # exact power of two for d_k=16

    w_pack = jnp.concatenate([wq * scale, wk, wv, wo], axis=1)             # (D, 4D)
    row0 = jnp.concatenate([bq * scale, bk, bv, bo], axis=1)               # (1, 4D)
    row1 = jnp.concatenate([gamma, beta, jnp.zeros((1, 2 * D), jnp.float32)], axis=1)
    vec_pack = jnp.concatenate(
        [row0, row1, jnp.zeros((6, 4 * D), jnp.float32)], axis=0)          # (8, 4D)

    # Structure constants (compile-time, built on host).
    # TODO(synk): above P ~ 32-64 the (HP, HP) blk_ones and the block-diagonal
    #             expansion get wasteful (O(H) redundant MACs, O(HP^2) consts);
    #             switch to per-head lane-blocked matmuls / compact-sum there.
    HP = HEAD * P
    rows = np.arange(HP)[:, None]
    head_of_row = rows // P
    maskc = (np.arange(D)[None, :] // d_k == head_of_row).astype(np.float32)    # (HP, D)
    blk_ones = (np.arange(HP)[None, :] // P == head_of_row).astype(np.float32)  # (HP, HP)
    t_mean = np.zeros((HP, P_pad), np.float32)
    t_mean[np.arange(HP), np.arange(HP) % P] = 1.0 / HEAD                        # (HP, P_pad)
    const_pack = jnp.asarray(np.concatenate([maskc, blk_ones, t_mean], axis=1))
    return w_pack, vec_pack, const_pack


def contra_forward(lang_fea, bbox_feature, params, input_dtype=jnp.float32):
    """Pallas implementation of ContraModule.forward (eval mode).

    lang_fea:      (bs * len_num_max, max_des_len, D)
    bbox_feature:  (bs, num_proposal, D)
    input_dtype:   feed jnp.bfloat16 on HBM-bandwidth-poor v5e to halve the
                   dominant lang-slab DMA bytes (relax tolerances accordingly).
    """
    BSL, T, D = lang_fea.shape
    bs, P, _ = bbox_feature.shape
    L = BSL // bs
    P_pad = ((P + 127) // 128) * 128
    HP = HEAD * P

    b_blk, n_steps, bs_pad = _choose_blocking(bs, L, P)

    w_pack, vec_pack, const_pack = _pack_params(params, D_K, P, P_pad)

    lang = lang_fea.astype(input_dtype)
    obj = bbox_feature.astype(input_dtype)
    w_pack = w_pack.astype(input_dtype)
    const_pack = const_pack.astype(input_dtype)

    if bs_pad > bs:                                   # balance the v7x steps
        pad = bs_pad - bs
        lang = jnp.concatenate(
            [lang.reshape(bs, L, T, D),
             jnp.zeros((pad, L, T, D), lang.dtype)], axis=0).reshape(bs_pad * L, T, D)
        obj = jnp.concatenate([obj, jnp.zeros((pad, P, D), obj.dtype)], axis=0)

    obj_flat = obj.reshape(bs_pad * P, D)             # plain 2-D slab DMA per step

    kernel = functools.partial(
        _contra_kernel, b_blk=b_blk, n_head=HEAD, L=L, P=P, D=D, P_pad=P_pad)

    grid_spec = pltpu.PrefetchScalarGridSpec(
        num_scalar_prefetch=0,
        grid=(n_steps,),
        in_specs=[
            pl.BlockSpec((b_blk * L, T, D), lambda i: (i, 0, 0)),     # lang slab
            pl.BlockSpec((b_blk * P, D), lambda i: (i, 0)),           # object feats (flat)
            pl.BlockSpec((D, 4 * D), lambda i: (0, 0)),               # packed weights
            pl.BlockSpec((8, 4 * D), lambda i: (0, 0)),               # biases / LN vecs
            pl.BlockSpec((HP, D + HP + P_pad), lambda i: (0, 0)),     # structure consts
        ],
        out_specs=[
            pl.BlockSpec((b_blk * L, D), lambda i: (i, 0)),           # ori_lang_feat
            pl.BlockSpec((b_blk * L, D), lambda i: (i, 0)),           # contra_lang_feat
            pl.BlockSpec((b_blk * L, P_pad), lambda i: (i, 0)),       # contra_att_weight (padded)
        ],
        scratch_shapes=[
            pltpu.VMEM((b_blk * L, D), jnp.float32),                  # q (pre-scaled)
            pltpu.VMEM((b_blk * P, 2 * D), jnp.float32),              # [k | v]
            pltpu.VMEM((b_blk * L, D), jnp.float32),                  # ctx staging
        ],
    )
    out_shapes = (
        jax.ShapeDtypeStruct((bs_pad * L, D), jnp.float32),
        jax.ShapeDtypeStruct((bs_pad * L, D), jnp.float32),
        jax.ShapeDtypeStruct((bs_pad * L, P_pad), jnp.float32),
    )
    ori, contra, attw = pl.pallas_call(
        kernel,
        out_shape=out_shapes,
        grid_spec=grid_spec,
        compiler_params=pltpu.CompilerParams(
            dimension_semantics=("parallel",)),
    )(lang, obj_flat, w_pack, vec_pack, const_pack)

    return {
        "ori_lang_feat": ori.reshape(bs_pad, L, D)[:bs],
        "contra_lang_feat": contra.reshape(bs_pad, L, D)[:bs],
        "contra_att_weight": attw.reshape(bs_pad, L, P_pad)[:bs, :, :P],
    }


def ref_forward(lang_fea, bbox_feature, params):
    """Pure-JAX reference mirroring the PyTorch forward (eval mode)."""
    wq, bq, wk, bk, wv, bv, wo, bo, gamma, beta = params
    BSL, T, D = lang_fea.shape
    bs, P, _ = bbox_feature.shape
    L = BSL // bs

    lang = lang_fea.reshape(bs, L, T, D).max(axis=2)              # (bs, L, D)
    q = lang @ wq + bq[0]
    k = bbox_feature @ wk + bk[0]
    v = bbox_feature @ wv + bv[0]
    qh = q.reshape(bs, L, HEAD, D_K).transpose(0, 2, 1, 3)        # (bs, h, L, dk)
    kh = k.reshape(bs, P, HEAD, D_K).transpose(0, 2, 3, 1)        # (bs, h, dk, P)
    vh = v.reshape(bs, P, HEAD, D_V).transpose(0, 2, 1, 3)        # (bs, h, P, dv)
    att = jax.nn.softmax(jnp.matmul(qh, kh) / math.sqrt(D_K), axis=-1)
    out = jnp.matmul(att, vh).transpose(0, 2, 1, 3).reshape(bs, L, HEAD * D_V)
    out = out @ wo + bo[0]
    x = lang + out
    mu = x.mean(-1, keepdims=True)
    var = ((x - mu) ** 2).mean(-1, keepdims=True)
    y = (x - mu) / jnp.sqrt(var + LN_EPS) * gamma[0] + beta[0]
    return lang, y, att.mean(axis=1)


def init_params(key):
    keys = jax.random.split(key, 8)
    s = 0.05
    wq = s * jax.random.normal(keys[0], (HIDDEN, HEAD * D_K), jnp.float32)
    bq = s * jax.random.normal(keys[1], (1, HEAD * D_K), jnp.float32)
    wk = s * jax.random.normal(keys[2], (HIDDEN, HEAD * D_K), jnp.float32)
    bk = s * jax.random.normal(keys[3], (1, HEAD * D_K), jnp.float32)
    wv = s * jax.random.normal(keys[4], (HIDDEN, HEAD * D_V), jnp.float32)
    bv = s * jax.random.normal(keys[5], (1, HEAD * D_V), jnp.float32)
    wo = s * jax.random.normal(keys[6], (HEAD * D_V, HIDDEN), jnp.float32)
    bo = s * jax.random.normal(keys[7], (1, HIDDEN), jnp.float32)
    gamma = jnp.ones((1, HIDDEN), jnp.float32)
    beta = jnp.zeros((1, HIDDEN), jnp.float32)
    return (wq, bq, wk, bk, wv, bv, wo, bo, gamma, beta)


if __name__ == "__main__":
    master = jax.random.PRNGKey(0)

    def run_case(case_key, bs, len_num_max, max_des_len, num_proposal):
        k1, k2, k3 = jax.random.split(case_key, 3)
        lang_fea = jax.random.normal(
            k1, (bs * len_num_max, max_des_len, HIDDEN), jnp.float32)
        bbox_feature = jax.random.normal(
            k2, (bs, num_proposal, HIDDEN), jnp.float32)
        params = init_params(k3)

        out = contra_forward(lang_fea, bbox_feature, params)
        jax.block_until_ready(out)

        ref_ori, ref_contra, ref_attw = ref_forward(lang_fea, bbox_feature, params)
        assert out["ori_lang_feat"].shape == ref_ori.shape
        assert jnp.allclose(out["ori_lang_feat"], ref_ori, atol=1e-5, rtol=1e-5)
        assert jnp.allclose(out["contra_lang_feat"], ref_contra, atol=1e-4, rtol=1e-4)
        assert jnp.allclose(out["contra_att_weight"], ref_attw, atol=1e-4, rtol=1e-4)

    keys = jax.random.split(master, 3)
    # single-TC: grid=(1,), b_blk=2 ; v7x: grid=(2,), b_blk=1
    run_case(keys[0], bs=2, len_num_max=8, max_des_len=8, num_proposal=16)
    # single-TC: grid=(1,), b_blk=8 ; v7x: grid=(2,), b_blk=4
    run_case(keys[1], bs=8, len_num_max=8, max_des_len=8, num_proposal=16)
    # odd batch: exercises the batch-padding path on v7x
    run_case(keys[2], bs=3, len_num_max=8, max_des_len=8, num_proposal=16)

    print("KERNEL_OK")
</pallas_src>

<mosaic_0001>
module attributes {stable_mosaic.version = 11 : i64} {
  func.func @_contra_kernel(%arg0: i32, %arg1: memref<16x8x128xf32, #tpu.memory_space<vmem>>, %arg2: memref<32x128xf32, #tpu.memory_space<vmem>>, %arg3: memref<128x512xf32, #tpu.memory_space<vmem>>, %arg4: memref<8x512xf32, #tpu.memory_space<vmem>>, %arg5: memref<128x384xf32, #tpu.memory_space<vmem>>, %arg6: memref<16x128xf32, #tpu.memory_space<vmem>>, %arg7: memref<16x128xf32, #tpu.memory_space<vmem>>, %arg8: memref<16x128xf32, #tpu.memory_space<vmem>>, %arg9: memref<16x128xf32, #tpu.memory_space<vmem>>, %arg10: memref<32x256xf32, #tpu.memory_space<vmem>>, %arg11: memref<16x128xf32, #tpu.memory_space<vmem>>) attributes {dimension_semantics = [#tpu.dimension_semantics<parallel>], iteration_bounds = array<i64: 1>, scalar_prefetch = 0 : i64, scratch_operands = 3 : i64, tpu.core_type = #tpu.core_type<tc>, window_params = [{transform_indices = @transform_0, window_bounds = array<i64: 16, 8, 128>}, {transform_indices = @transform_1, window_bounds = array<i64: 32, 128>}, {pipeline_mode = #tpu.pipeline_mode<synchronous>, transform_indices = @transform_2, window_bounds = array<i64: 128, 512>}, {pipeline_mode = #tpu.pipeline_mode<synchronous>, transform_indices = @transform_3, window_bounds = array<i64: 8, 512>}, {pipeline_mode = #tpu.pipeline_mode<synchronous>, transform_indices = @transform_4, window_bounds = array<i64: 128, 384>}, {transform_indices = @transform_5, window_bounds = array<i64: 16, 128>}, {transform_indices = @transform_6, window_bounds = array<i64: 16, 128>}, {transform_indices = @transform_7, window_bounds = array<i64: 16, 128>}]} {
    %c0 = arith.constant 0 : index
    %c0_0 = arith.constant 0 : index
    %c0_1 = arith.constant 0 : index
    %0 = vector.load %arg1[%c0, %c0_0, %c0_1] : memref<16x8x128xf32, #tpu.memory_space<vmem>>, vector<8x8x128xf32>
    %cst = arith.constant dense<0xFF800000> : vector<8x128xf32>
    %1 = vector.multi_reduction <maximumf>, %0, %cst [1] : vector<8x8x128xf32> to vector<8x128xf32>
    %c0_2 = arith.constant 0 : index
    %c0_3 = arith.constant 0 : index
    %2 = vector.load %arg6[%c0_2, %c0_3] : memref<16x128xf32, #tpu.memory_space<vmem>>, vector<8x128xf32>
    tpu.vector_store %arg6[%c0_2, %c0_3], %1 {strides = array<i32>} : memref<16x128xf32, #tpu.memory_space<vmem>>, vector<8x128xf32>,
    %c8 = arith.constant 8 : index
    %c0_4 = arith.constant 0 : index
    %c0_5 = arith.constant 0 : index
    %3 = vector.load %arg1[%c8, %c0_4, %c0_5] : memref<16x8x128xf32, #tpu.memory_space<vmem>>, vector<8x8x128xf32>
    %cst_6 = arith.constant dense<0xFF800000> : vector<8x128xf32>
    %4 = vector.multi_reduction <maximumf>, %3, %cst_6 [1] : vector<8x8x128xf32> to vector<8x128xf32>
    %c8_7 = arith.constant 8 : index
    %c0_8 = arith.constant 0 : index
    %5 = vector.load %arg6[%c8_7, %c0_8] : memref<16x128xf32, #tpu.memory_space<vmem>>, vector<8x128xf32>
    tpu.vector_store %arg6[%c8_7, %c0_8], %4 {strides = array<i32>} : memref<16x128xf32, #tpu.memory_space<vmem>>, vector<8x128xf32>,
    %c0_9 = arith.constant 0 : index
    %c0_10 = arith.constant 0 : index
    %6 = vector.load %arg4[%c0_9, %c0_10] : memref<8x512xf32, #tpu.memory_space<vmem>>, vector<1x128xf32>
    %c0_11 = arith.constant 0 : index
    %c128 = arith.constant 128 : index
    %7 = vector.load %arg4[%c0_11, %c128] : memref<8x512xf32, #tpu.memory_space<vmem>>, vector<1x256xf32>
    %c0_12 = arith.constant 0 : index
    %c384 = arith.constant 384 : index
    %8 = vector.load %arg4[%c0_12, %c384] : memref<8x512xf32, #tpu.memory_space<vmem>>, vector<1x128xf32>
    %c1 = arith.constant 1 : index
    %c0_13 = arith.constant 0 : index
    %9 = vector.load %arg4[%c1, %c0_13] : memref<8x512xf32, #tpu.memory_space<vmem>>, vector<1x128xf32>
    %c1_14 = arith.constant 1 : index
    %c128_15 = arith.constant 128 : index
    %10 = vector.load %arg4[%c1_14, %c128_15] : memref<8x512xf32, #tpu.memory_space<vmem>>, vector<1x128xf32>
    %c0_16 = arith.constant 0 : index
    %c0_17 = arith.constant 0 : index
    %11 = vector.load %arg6[%c0_16, %c0_17] : memref<16x128xf32, #tpu.memory_space<vmem>>, vector<16x128xf32>
    %c0_18 = arith.constant 0 : index
    %c0_19 = arith.constant 0 : index
    %12 = vector.load %arg3[%c0_18, %c0_19] : memref<128x512xf32, #tpu.memory_space<vmem>>, vector<128x128xf32>
    %cst_20 = arith.constant dense<0.000000e+00> : vector<16x128xf32>
    %13 = tpu.matmul %11, %12, %cst_20 {dimension_numbers = #tpu.dot_dimension_numbers<[1], [0], [0], [1], [0, 0, 1, 1], [], []>} : vector<16x128xf32>, vector<128x128xf32>, vector<16x128xf32> -> vector<16x128xf32>
    %14 = vector.broadcast %6 : vector<1x128xf32> to vector<16x128xf32>
    %15 = arith.addf %13, %14 : vector<16x128xf32>
    %c0_21 = arith.constant 0 : index
    %c0_22 = arith.constant 0 : index
    %16 = vector.load %arg9[%c0_21, %c0_22] : memref<16x128xf32, #tpu.memory_space<vmem>>, vector<16x128xf32>
    tpu.vector_store %arg9[%c0_21, %c0_22], %15 {strides = array<i32>} : memref<16x128xf32, #tpu.memory_space<vmem>>, vector<16x128xf32>,
    %c0_23 = arith.constant 0 : index
    %c0_24 = arith.constant 0 : index
    %17 = vector.load %arg2[%c0_23, %c0_24] : memref<32x128xf32, #tpu.memory_space<vmem>>, vector<32x128xf32>
    %c0_25 = arith.constant 0 : index
    %c128_26 = arith.constant 128 : index
    %18 = vector.load %arg3[%c0_25, %c128_26] : memref<128x512xf32, #tpu.memory_space<vmem>>, vector<128x256xf32>
    %cst_27 = arith.constant dense<0.000000e+00> : vector<32x256xf32>
    %19 = tpu.matmul %17, %18, %cst_27 {dimension_numbers = #tpu.dot_dimension_numbers<[1], [0], [0], [1], [0, 0, 1, 1], [], []>} : vector<32x128xf32>, vector<128x256xf32>, vector<32x256xf32> -> vector<32x256xf32>
    %20 = vector.broadcast %7 : vector<1x256xf32> to vector<32x256xf32>
    %21 = arith.addf %19, %20 : vector<32x256xf32>
    %c0_28 = arith.constant 0 : index
    %c0_29 = arith.constant 0 : index
    %22 = vector.load %arg10[%c0_28, %c0_29] : memref<32x256xf32, #tpu.memory_space<vmem>>, vector<32x256xf32>
    tpu.vector_store %arg10[%c0_28, %c0_29], %21 {strides = array<i32>} : memref<32x256xf32, #tpu.memory_space<vmem>>, vector<32x256xf32>,
    %c0_30 = arith.constant 0 : index
    %c0_31 = arith.constant 0 : index
    %23 = vector.load %arg9[%c0_30, %c0_31] : memref<16x128xf32, #tpu.memory_space<vmem>>, vector<8x128xf32>
    %c0_32 = arith.constant 0 : index
    %c0_33 = arith.constant 0 : index
    %24 = vector.load %arg10[%c0_32, %c0_33] : memref<32x256xf32, #tpu.memory_space<vmem>>, vector<16x256xf32>
    %25 = vector.extract_strided_slice %24 {offsets = [0, 0], sizes = [16, 128], strides = [1, 1]} : vector<16x256xf32> to vector<16x128xf32>
    %26 = vector.extract_strided_slice %24 {offsets = [0, 128], sizes = [16, 128], strides = [1, 1]} : vector<16x256xf32> to vector<16x128xf32>
    %c0_34 = arith.constant 0 : index
    %c0_35 = arith.constant 0 : index
    %27 = vector.load %arg5[%c0_34, %c0_35] : memref<128x384xf32, #tpu.memory_space<vmem>>, vector<128x128xf32>
    %28 = tpu.concatenate %25, %25, %25, %25, %25, %25, %25, %25 in 0 : vector<16x128xf32>, vector<16x128xf32>, vector<16x128xf32>, vector<16x128xf32>, vector<16x128xf32>, vector<16x128xf32>, vector<16x128xf32>, vector<16x128xf32> -> vector<128x128xf32>
    %29 = arith.mulf %28, %27 : vector<128x128xf32>
    %30 = tpu.concatenate %26, %26, %26, %26, %26, %26, %26, %26 in 0 : vector<16x128xf32>, vector<16x128xf32>, vector<16x128xf32>, vector<16x128xf32>, vector<16x128xf32>, vector<16x128xf32>, vector<16x128xf32>, vector<16x128xf32> -> vector<128x128xf32>
    %31 = arith.mulf %30, %27 : vector<128x128xf32>
    %c0_36 = arith.constant 0 : index
    %c256 = arith.constant 256 : index
    %32 = vector.load %arg5[%c0_36, %c256] : memref<128x384xf32, #tpu.memory_space<vmem>>, vector<128x128xf32>
    %33 = tpu.concatenate %31, %32 in 1 : vector<128x128xf32>, vector<128x128xf32> -> vector<128x256xf32>
    %cst_37 = arith.constant dense<0.000000e+00> : vector<8x128xf32>
    %34 = tpu.matmul %23, %29, %cst_37 {dimension_numbers = #tpu.dot_dimension_numbers<[1], [1], [0], [0], [0, 0, 1, 0], [], []>} : vector<8x128xf32>, vector<128x128xf32>, vector<8x128xf32> -> vector<8x128xf32>
    %cst_38 = arith.constant dense<0xFF800000> : vector<8xf32>
    %35 = vector.multi_reduction <maximumf>, %34, %cst_38 [1] : vector<8x128xf32> to vector<8xf32>
    %36 = vector.shape_cast %35 : vector<8xf32> to vector<8x1xf32>
    %37 = vector.broadcast %36 : vector<8x1xf32> to vector<8x128xf32>
    %38 = arith.subf %34, %37 : vector<8x128xf32>
    %39 = math.exp %38 : vector<8x128xf32>
    %c0_39 = arith.constant 0 : index
    %c128_40 = arith.constant 128 : index
    %40 = vector.load %arg5[%c0_39, %c128_40] : memref<128x384xf32, #tpu.memory_space<vmem>>, vector<128x128xf32>
    %cst_41 = arith.constant dense<0.000000e+00> : vector<8x128xf32>
    %41 = tpu.matmul %39, %40, %cst_41 {dimension_numbers = #tpu.dot_dimension_numbers<[1], [0], [0], [1], [0, 0, 1, 1], [], []>} : vector<8x128xf32>, vector<128x128xf32>, vector<8x128xf32> -> vector<8x128xf32>
    %cst_42 = arith.constant 1.000000e-30 : f32
    %42 = vector.broadcast %cst_42 : f32 to vector<8x128xf32>
    %43 = arith.maximumf %41, %42 : vector<8x128xf32>
    %44 = tpu.reciprocal %43 {approx = true} : vector<8x128xf32> -> vector<8x128xf32>
    %45 = arith.mulf %43, %44 : vector<8x128xf32>
    %cst_43 = arith.constant 2.000000e+00 : f32
    %46 = vector.broadcast %cst_43 : f32 to vector<8x128xf32>
    %47 = arith.subf %46, %45 : vector<8x128xf32>
    %48 = arith.mulf %44, %47 : vector<8x128xf32>
    %49 = arith.mulf %39, %48 : vector<8x128xf32>
    %cst_44 = arith.constant dense<0.000000e+00> : vector<8x256xf32>
    %50 = tpu.matmul %49, %33, %cst_44 {dimension_numbers = #tpu.dot_dimension_numbers<[1], [0], [0], [1], [0, 0, 1, 1], [], []>} : vector<8x128xf32>, vector<128x256xf32>, vector<8x256xf32> -> vector<8x256xf32>
    %51 = vector.extract_strided_slice %50 {offsets = [0, 0], sizes = [8, 128], strides = [1, 1]} : vector<8x256xf32> to vector<8x128xf32>
    %c0_45 = arith.constant 0 : index
    %c0_46 = arith.constant 0 : index
    %52 = vector.load %arg11[%c0_45, %c0_46] : memref<16x128xf32, #tpu.memory_space<vmem>>, vector<8x128xf32>
    tpu.vector_store %arg11[%c0_45, %c0_46], %51 {strides = array<i32>} : memref<16x128xf32, #tpu.memory_space<vmem>>, vector<8x128xf32>,
    %53 = vector.extract_strided_slice %50 {offsets = [0, 128], sizes = [8, 128], strides = [1, 1]} : vector<8x256xf32> to vector<8x128xf32>
    %c0_47 = arith.constant 0 : index
    %c0_48 = arith.constant 0 : index
    %54 = vector.load %arg8[%c0_47, %c0_48] : memref<16x128xf32, #tpu.memory_space<vmem>>, vector<8x128xf32>
    tpu.vector_store %arg8[%c0_47, %c0_48], %53 {strides = array<i32>} : memref<16x128xf32, #tpu.memory_space<vmem>>, vector<8x128xf32>,
    %c8_49 = arith.constant 8 : index
    %c0_50 = arith.constant 0 : index
    %55 = vector.load %arg9[%c8_49, %c0_50] : memref<16x128xf32, #tpu.memory_space<vmem>>, vector<8x128xf32>
    %c16 = arith.constant 16 : index
    %c0_51 = arith.constant 0 : index
    %56 = vector.load %arg10[%c16, %c0_51] : memref<32x256xf32, #tpu.memory_space<vmem>>, vector<16x256xf32>
    %57 = vector.extract_strided_slice %56 {offsets = [0, 0], sizes = [16, 128], strides = [1, 1]} : vector<16x256xf32> to vector<16x128xf32>
    %58 = vector.extract_strided_slice %56 {offsets = [0, 128], sizes = [16, 128], strides = [1, 1]} : vector<16x256xf32> to vector<16x128xf32>
    %c0_52 = arith.constant 0 : index
    %c0_53 = arith.constant 0 : index
    %59 = vector.load %arg5[%c0_52, %c0_53] : memref<128x384xf32, #tpu.memory_space<vmem>>, vector<128x128xf32>
    %60 = tpu.concatenate %57, %57, %57, %57, %57, %57, %57, %57 in 0 : vector<16x128xf32>, vector<16x128xf32>, vector<16x128xf32>, vector<16x128xf32>, vector<16x128xf32>, vector<16x128xf32>, vector<16x128xf32>, vector<16x128xf32> -> vector<128x128xf32>
    %61 = arith.mulf %60, %59 : vector<128x128xf32>
    %62 = tpu.concatenate %58, %58, %58, %58, %58, %58, %58, %58 in 0 : vector<16x128xf32>, vector<16x128xf32>, vector<16x128xf32>, vector<16x128xf32>, vector<16x128xf32>, vector<16x128xf32>, vector<16x128xf32>, vector<16x128xf32> -> vector<128x128xf32>
    %63 = arith.mulf %62, %59 : vector<128x128xf32>
    %c0_54 = arith.constant 0 : index
    %c256_55 = arith.constant 256 : index
    %64 = vector.load %arg5[%c0_54, %c256_55] : memref<128x384xf32, #tpu.memory_space<vmem>>, vector<128x128xf32>
    %65 = tpu.concatenate %63, %64 in 1 : vector<128x128xf32>, vector<128x128xf32> -> vector<128x256xf32>
    %cst_56 = arith.constant dense<0.000000e+00> : vector<8x128xf32>
    %66 = tpu.matmul %55, %61, %cst_56 {dimension_numbers = #tpu.dot_dimension_numbers<[1], [1], [0], [0], [0, 0, 1, 0], [], []>} : vector<8x128xf32>, vector<128x128xf32>, vector<8x128xf32> -> vector<8x128xf32>
    %cst_57 = arith.constant dense<0xFF800000> : vector<8xf32>
    %67 = vector.multi_reduction <maximumf>, %66, %cst_57 [1] : vector<8x128xf32> to vector<8xf32>
    %68 = vector.shape_cast %67 : vector<8xf32> to vector<8x1xf32>
    %69 = vector.broadcast %68 : vector<8x1xf32> to vector<8x128xf32>
    %70 = arith.subf %66, %69 : vector<8x128xf32>
    %71 = math.exp %70 : vector<8x128xf32>
    %c0_58 = arith.constant 0 : index
    %c128_59 = arith.constant 128 : index
    %72 = vector.load %arg5[%c0_58, %c128_59] : memref<128x384xf32, #tpu.memory_space<vmem>>, vector<128x128xf32>
    %cst_60 = arith.constant dense<0.000000e+00> : vector<8x128xf32>
    %73 = tpu.matmul %71, %72, %cst_60 {dimension_numbers = #tpu.dot_dimension_numbers<[1], [0], [0], [1], [0, 0, 1, 1], [], []>} : vector<8x128xf32>, vector<128x128xf32>, vector<8x128xf32> -> vector<8x128xf32>
    %cst_61 = arith.constant 1.000000e-30 : f32
    %74 = vector.broadcast %cst_61 : f32 to vector<8x128xf32>
    %75 = arith.maximumf %73, %74 : vector<8x128xf32>
    %76 = tpu.reciprocal %75 {approx = true} : vector<8x128xf32> -> vector<8x128xf32>
    %77 = arith.mulf %75, %76 : vector<8x128xf32>
    %cst_62 = arith.constant 2.000000e+00 : f32
    %78 = vector.broadcast %cst_62 : f32 to vector<8x128xf32>
    %79 = arith.subf %78, %77 : vector<8x128xf32>
    %80 = arith.mulf %76, %79 : vector<8x128xf32>
    %81 = arith.mulf %71, %80 : vector<8x128xf32>
    %cst_63 = arith.constant dense<0.000000e+00> : vector<8x256xf32>
    %82 = tpu.matmul %81, %65, %cst_63 {dimension_numbers = #tpu.dot_dimension_numbers<[1], [0], [0], [1], [0, 0, 1, 1], [], []>} : vector<8x128xf32>, vector<128x256xf32>, vector<8x256xf32> -> vector<8x256xf32>
    %83 = vector.extract_strided_slice %82 {offsets = [0, 0], sizes = [8, 128], strides = [1, 1]} : vector<8x256xf32> to vector<8x128xf32>
    %c8_64 = arith.constant 8 : index
    %c0_65 = arith.constant 0 : index
    %84 = vector.load %arg11[%c8_64, %c0_65] : memref<16x128xf32, #tpu.memory_space<vmem>>, vector<8x128xf32>
    tpu.vector_store %arg11[%c8_64, %c0_65], %83 {strides = array<i32>} : memref<16x128xf32, #tpu.memory_space<vmem>>, vector<8x128xf32>,
    %85 = vector.extract_strided_slice %82 {offsets = [0, 128], sizes = [8, 128], strides = [1, 1]} : vector<8x256xf32> to vector<8x128xf32>
    %c8_66 = arith.constant 8 : index
    %c0_67 = arith.constant 0 : index
    %86 = vector.load %arg8[%c8_66, %c0_67] : memref<16x128xf32, #tpu.memory_space<vmem>>, vector<8x128xf32>
    tpu.vector_store %arg8[%c8_66, %c0_67], %85 {strides = array<i32>} : memref<16x128xf32, #tpu.memory_space<vmem>>, vector<8x128xf32>,
    %c0_68 = arith.constant 0 : index
    %c0_69 = arith.constant 0 : index
    %87 = vector.load %arg11[%c0_68, %c0_69] : memref<16x128xf32, #tpu.memory_space<vmem>>, vector<16x128xf32>
    %c0_70 = arith.constant 0 : index
    %c384_71 = arith.constant 384 : index
    %88 = vector.load %arg3[%c0_70, %c384_71] : memref<128x512xf32, #tpu.memory_space<vmem>>, vector<128x128xf32>
    %cst_72 = arith.constant dense<0.000000e+00> : vector<16x128xf32>
    %89 = tpu.matmul %87, %88, %cst_72 {dimension_numbers = #tpu.dot_dimension_numbers<[1], [0], [0], [1], [0, 0, 1, 1], [], []>} : vector<16x128xf32>, vector<128x128xf32>, vector<16x128xf32> -> vector<16x128xf32>
    %90 = vector.broadcast %8 : vector<1x128xf32> to vector<16x128xf32>
    %91 = arith.addf %89, %90 : vector<16x128xf32>
    %c0_73 = arith.constant 0 : index
    %c0_74 = arith.constant 0 : index
    %92 = vector.load %arg6[%c0_73, %c0_74] : memref<16x128xf32, #tpu.memory_space<vmem>>, vector<16x128xf32>
    %93 = arith.addf %92, %91 : vector<16x128xf32>
    %cst_75 = arith.constant dense<0.000000e+00> : vector<16xf32>
    %94 = vector.multi_reduction <add>, %93, %cst_75 [1] : vector<16x128xf32> to vector<16xf32>
    %95 = vector.shape_cast %94 : vector<16xf32> to vector<16x1xf32>
    %cst_76 = arith.constant 1.280000e+02 : f32
    %96 = vector.broadcast %cst_76 : f32 to vector<16x1xf32>
    %97 = arith.divf %95, %96 : vector<16x1xf32>
    %98 = vector.broadcast %97 : vector<16x1xf32> to vector<16x128xf32>
    %99 = arith.subf %93, %98 : vector<16x128xf32>
    %100 = arith.mulf %99, %99 : vector<16x128xf32>
    %cst_77 = arith.constant dense<0.000000e+00> : vector<16xf32>
    %101 = vector.multi_reduction <add>, %100, %cst_77 [1] : vector<16x128xf32> to vector<16xf32>
    %102 = vector.shape_cast %101 : vector<16xf32> to vector<16x1xf32>
    %cst_78 = arith.constant 1.280000e+02 : f32
    %103 = vector.broadcast %cst_78 : f32 to vector<16x1xf32>
    %104 = arith.divf %102, %103 : vector<16x1xf32>
    %cst_79 = arith.constant 9.99999974E-6 : f32
    %105 = vector.broadcast %cst_79 : f32 to vector<16x1xf32>
    %106 = arith.addf %104, %105 : vector<16x1xf32>
    %107 = math.rsqrt %106 : vector<16x1xf32>
    %108 = vector.broadcast %107 : vector<16x1xf32> to vector<16x128xf32>
    %109 = arith.mulf %99, %108 : vector<16x128xf32>
    %110 = vector.broadcast %9 : vector<1x128xf32> to vector<16x128xf32>
    %111 = arith.mulf %109, %110 : vector<16x128xf32>
    %112 = vector.broadcast %10 : vector<1x128xf32> to vector<16x128xf32>
    %113 = arith.addf %111, %112 : vector<16x128xf32>
    %c0_80 = arith.constant 0 : index
    %c0_81 = arith.constant 0 : index
    %114 = vector.load %arg7[%c0_80, %c0_81] : memref<16x128xf32, #tpu.memory_space<vmem>>, vector<16x128xf32>
    tpu.vector_store %arg7[%c0_80, %c0_81], %113 {strides = array<i32>} : memref<16x128xf32, #tpu.memory_space<vmem>>, vector<16x128xf32>,
    return
  }
  func.func @transform_0(%arg0: i32) -> (i32, i32, i32) {
    %c0_i32 = arith.constant 0 : i32
    %c0_i32_0 = arith.constant 0 : i32
    %c0_i32_1 = arith.constant 0 : i32
    return %arg0, %c0_i32, %c0_i32_0 : i32, i32, i32
  }
  func.func @transform_1(%arg0: i32) -> (i32, i32) {
    %c0_i32 = arith.constant 0 : i32
    %c0_i32_0 = arith.constant 0 : i32
    return %arg0, %c0_i32 : i32, i32
  }
  func.func @transform_2(%arg0: i32) -> (i32, i32) {
    %c0_i32 = arith.constant 0 : i32
    %c0_i32_0 = arith.constant 0 : i32
    %c0_i32_1 = arith.constant 0 : i32
    return %c0_i32, %c0_i32_0 : i32, i32
  }
  func.func @transform_3(%arg0: i32) -> (i32, i32) {
    %c0_i32 = arith.constant 0 : i32
    %c0_i32_0 = arith.constant 0 : i32
    %c0_i32_1 = arith.constant 0 : i32
    return %c0_i32, %c0_i32_0 : i32, i32
  }
  func.func @transform_4(%arg0: i32) -> (i32, i32) {
    %c0_i32 = arith.constant 0 : i32
    %c0_i32_0 = arith.constant 0 : i32
    %c0_i32_1 = arith.constant 0 : i32
    return %c0_i32, %c0_i32_0 : i32, i32
  }
  func.func @transform_5(%arg0: i32) -> (i32, i32) {
    %c0_i32 = arith.constant 0 : i32
    %c0_i32_0 = arith.constant 0 : i32
    return %arg0, %c0_i32 : i32, i32
  }
  func.func @transform_6(%arg0: i32) -> (i32, i32) {
    %c0_i32 = arith.constant 0 : i32
    %c0_i32_0 = arith.constant 0 : i32
    return %arg0, %c0_i32 : i32, i32
  }
  func.func @transform_7(%arg0: i32) -> (i32, i32) {
    %c0_i32 = arith.constant 0 : i32
    %c0_i32_0 = arith.constant 0 : i32
    return %arg0, %c0_i32 : i32, i32
  }
}

</mosaic_0001>

<bundles_post_ra>
// kernel: tpu_custom_call.1
= control target key start
LH: loop header
LB: loop body
LE: loop exit
PB: predicated region body
PF: predicated region fallthrough
CT: control target
= control target key end

     0   :  { %13 = vsyncpa [#allocation6], 0  ;;  %s1510_s0 = inlined_call_operand.hbm [shape: f32[16,8,128], index: 0, kind: input, shape index: {}]   ;;  %s1511_s1 = inlined_call_operand.hbm [shape: f32[32,128], index: 1, kind: input, shape index: {}]   ;;  %s1512_s2 = inlined_call_operand.hbm [shape: f32[128,512], index: 2, kind: input, shape index: {}]   ;;  %s1513_s3 = inlined_call_operand.hbm [shape: f32[8,512], index: 3, kind: input, shape index: {}]   ;;  %s1514_s4 = inlined_call_operand.hbm [shape: f32[128,384], index: 4, kind: input, shape index: {}]   ;;  %s1515_s5 = inlined_call_operand.hbm [shape: f32[16,128], index: 5, kind: output, shape index: {0}]   ;;  %s1516_s6 = inlined_call_operand.hbm [shape: f32[16,128], index: 6, kind: output, shape index: {1}]   ;;  %s1517_s7 = inlined_call_operand.hbm [shape: f32[16,128], index: 7, kind: output, shape index: {2}]  }
   0x1   :  { %14 = vsyncpa [#allocation9], 0 }
   0x2   :  { %15 = vsyncpa [#allocation12], 0 }
   0x3   :  { %16 = vsyncpa [#allocation7], 0 }
   0x4   :  { %17 = vsyncpa [#allocation16], 0  ;;  %s35_s26 = sshll.u32 %s1511_s1, 4  ;;  %s1152_s27 = smov [#allocation8]   ;;  %s36_s26 = int_to_ptr.hbm [resolvable:$true] %s35_s26 }
   0x5   :  { %s37_s28 = sshll.u32 %s1152_s27, 4  ;;  %s62_s8 = sshll.u32 %s1513_s3, 4  ;;  %s38_s28 = int_to_ptr.vmem [resolvable:$true] %s37_s28  ;;  %s63_s8 = int_to_ptr.hbm [resolvable:$true] %s62_s8 }
   0x6   :  { %s1153_s9 = smov 128   ;;  %s1154_s10 = smov 8  }
   0x7   :  { %43 = dma.hbm_to_vmem [thread:$0]  %s36_s26, 512, %s38_s28, [#allocation9], %s1153_s9, %s1153_s9, %s1154_s10  }
   0x8   :  { %s1155_s11 = smov [#allocation11]   ;;  %s22_s1 = sshll.u32 %s1510_s0, 4  ;;  %s23_s1 = int_to_ptr.hbm [resolvable:$true] %s22_s1 }
   0x9   :  { %s64_s12 = sshll.u32 %s1155_s11, 4  ;;  %s48_s3 = sshll.u32 %s1512_s2, 4  ;;  %s65_s12 = int_to_ptr.vmem [resolvable:$true] %s64_s12  ;;  %s49_s3 = int_to_ptr.hbm [resolvable:$true] %s48_s3 }
   0xa   :  { %67 = dma.hbm_to_vmem [thread:$0]  %s63_s8, 512, %s65_s12, [#allocation12]  }
   0xb   :  { %s1156_s17 = smov [#allocation5]   ;;  %s1157_s19 = smov [#allocation10]  }
   0xc   :  { %s24_s18 = sshll.u32 %s1156_s17, 4  ;;  %s50_s20 = sshll.u32 %s1157_s19, 4  ;;  %s25_s18 = int_to_ptr.vmem [resolvable:$true] %s24_s18  ;;  %s51_s20 = int_to_ptr.vmem [resolvable:$true] %s50_s20 }
   0xd   :  { %30 = dma.hbm_to_vmem [thread:$0]  %s23_s1, 2048, %s25_s18, [#allocation6], %s1153_s9, %s1153_s9, %s1154_s10  }
   0xe   :  { %s1158_s21 = smov 512   ;;  %s1159_s0 = smov 32  }
   0xf   :  { %56 = dma.hbm_to_vmem [thread:$0]  %s49_s3, 8192, %s51_s20, [#allocation9], %s1158_s21, %s1158_s21, %s1159_s0  }
  0x10   :  { %s72_s24 = sshll.u32 %s1514_s4, 4  ;;  %s1160_s2 = smov [#allocation13]   ;;  %s73_s24 = int_to_ptr.hbm [resolvable:$true] %s72_s24 }
  0x11   :  { %s74_s25 = sshll.u32 %s1160_s2, 4  ;;  %s1161_s26 = smov 384   ;;  %s75_s25 = int_to_ptr.vmem [resolvable:$true] %s74_s25 }
  0x12   :  { %s1162_s27 = smov 24  }
  0x13   :  { %80 = dma.hbm_to_vmem [thread:$0]  %s73_s24, 6144, %s75_s25, [#allocation12], %s1161_s26, %s1161_s26, %s1162_s27  }
  0x14   :  { %1142 = dma.done.wait [#allocation6], 2048  }
  0x15   :  { %1143 = vsyncadd [#allocation6], 4294965248 }
  0x16   :  { %1144 = dma.done.wait [#allocation9], 8704  }
  0x17   :  { %1145 = vsyncadd [#allocation9], 4294958592 }
  0x18   :  { %1146 = dma.done.wait [#allocation12], 6656  }
  0x19   :  { %1147 = vsyncadd [#allocation12], 4294960640  ;;  %v338_v0 = vld [vmem:[#allocation10 + $0x1e8] sm:$0xff]  ;;  %v278_v6 = vld [vmem:[#allocation10 + $0x1e0] sm:$0xff]  ;;  %vm165_vm0 = vcmask 1041409   ;;  %vm167_vm1 = vcmask 1042434  }
  0x1a   :  { %v336_v1 = vld [vmem:[#allocation10 + $0x1c8] sm:$0xff]  ;;  %345 = vmatpush.msra.mxu2 %v338_v0  ;;  %v277_v7 = vld [vmem:[#allocation10 + $0x1c0] sm:$0xff]  ;;  %279 = vmatpush.msra.mxu0 %v278_v6  ;;  %v103_v16 = vld [vmem:[#allocation5 + $0x10] sm:$0xff]  ;;  %vm169_vm2 = vcmask 1043459   ;;  %vm171_vm3 = vcmask 1044484   ;;  %vm173_vm4 = vcmask 1045509  }
  0x1b   :  { %v334_v2 = vld [vmem:[#allocation10 + $0x1a8] sm:$0xff]  ;;  %v276_v9 = vld [vmem:[#allocation10 + $0x1a0] sm:$0xff]  ;;  %v104_v17 = vld [vmem:[#allocation5 + $0x18] sm:$0xff]  ;;  %v121_v24 = vrot.slane %v103_v16, 4  ;;  %vm175_vm5 = vcmask 1046534   ;;  %vm177_vm6 = vcmask 1047559  }
  0x1c   :  { %346 = vmatpush.msra.mxu2 %v336_v1  ;;  %v332_v3 = vld [vmem:[#allocation10 + $0x188] sm:$0xff]  ;;  %280 = vmatpush.msra.mxu0 %v277_v7  ;;  %v275_v12 = vld [vmem:[#allocation10 + $0x180] sm:$0xff]  ;;  %v107_v22 = vld [vmem:[#allocation5 + $0x30] sm:$0xff]  ;;  %v127_v25 = vrot.slane %v104_v17, 4  ;;  %s871_s29 = sshll.u32 %s1515_s5, 4  ;;  %s1164_s30 = smov [#allocation14]   ;;  %s872_s29 = int_to_ptr.hbm [resolvable:$true] %s871_s29 }
  0x1d   :  { %v330_v4 = vld [vmem:[#allocation10 + $0x168] sm:$0xff]  ;;  %v274_v13 = vld [vmem:[#allocation10 + $0x160] sm:$0xff]  ;;  %v108_v23 = vld [vmem:[#allocation5 + $0x38] sm:$0xff]  ;;  %v145_v32 = vrot.slane %v107_v22, 4  ;;  %v122_v33 = vmax.f32 %v103_v16, %v121_v24  ;;  %s869_s8 = sshll.u32 %s1164_s30, 4  ;;  %s1165_s5 = smov [#allocation15]   ;;  %s870_s8 = int_to_ptr.vmem [resolvable:$true] %s869_s8 }
  0x1e   :  { %347 = vmatpush.msra.mxu2 %v334_v2  ;;  %v328_v5 = vld [vmem:[#allocation10 + $0x148] sm:$0xff]  ;;  %281 = vmatpush.msra.mxu0 %v276_v9  ;;  %v101_v14 = vld [vmem:[#allocation5] sm:$0xff]  ;;  %v128_v34 = vmax.f32 %v104_v17, %v127_v25  ;;  %v151_v36 = vrot.slane %v108_v23, 4  ;;  %s882_s11 = sshll.u32 %s1165_s5, 4  ;;  %s884_s14 = sshll.u32 %s1516_s6, 4  ;;  %s883_s11 = int_to_ptr.vmem [resolvable:$true] %s882_s11  ;;  %s885_s14 = int_to_ptr.hbm [resolvable:$true] %s884_s14 }
  0x1f   :  { %v326_v8 = vld [vmem:[#allocation10 + $0x128] sm:$0xff]  ;;  %v105_v18 = vld [vmem:[#allocation5 + $0x20] sm:$0xff]  ;;  %v109_v19 = vrot.slane %v101_v14, 4  ;;  %v146_v42 = vmax.f32 %v107_v22, %v145_v32  ;;  %v123_v43 = vrot.slane %v122_v33, 2  ;;  %s1166_s1 = smov [#allocation17]   ;;  %s897_s17 = sshll.u32 %s1517_s7, 4  ;;  %s898_s17 = int_to_ptr.hbm [resolvable:$true] %s897_s17 }
  0x20   :  { %348 = vmatpush.msra.mxu2 %v332_v3  ;;  %v324_v10 = vld [vmem:[#allocation10 + $0x108] sm:$0xff]  ;;  %282 = vmatpush.msra.mxu0 %v275_v12  ;;  %v133_v26 = vrot.slane %v105_v18, 4  ;;  %v273_v28 = vld [vmem:[#allocation10 + $0x140] sm:$0xff]  ;;  %v129_v44 = vrot.slane %v128_v34, 2  ;;  %v152_v46 = vmax.f32 %v108_v23, %v151_v36  ;;  %s895_s15 = sshll.u32 %s1166_s1, 4  ;;  %s896_s15 = int_to_ptr.vmem [resolvable:$true] %s895_s15 }
  0x21   :  { %v322_v11 = vld [vmem:[#allocation10 + $0xe8] sm:$0xff]  ;;  %v110_v29 = vmax.f32 %v101_v14, %v109_v19  ;;  %v272_v38 = vld [vmem:[#allocation10 + $0x120] sm:$0xff]  ;;  %v147_v52 = vrot.slane %v146_v42, 2  ;;  %v124_v53 = vmax.f32 %v122_v33, %v123_v43  ;;  %v1264_v43 = vld [vmem:[#allocation13 + $0x138] sm:$0xff] }
  0x22   :  { %349 = vmatpush.msra.mxu2 %v330_v4  ;;  %v102_v15 = vld [vmem:[#allocation5 + $0x8] sm:$0xff]  ;;  %283 = vmatpush.msra.mxu0 %v274_v13  ;;  %v134_v35 = vmax.f32 %v105_v18, %v133_v26  ;;  %v271_v48 = vld [vmem:[#allocation10 + $0x100] sm:$0xff]  ;;  %v130_v54 = vmax.f32 %v128_v34, %v129_v44  ;;  %v153_v56 = vrot.slane %v152_v46, 2 }
  0x23   :  { %v115_v20 = vrot.slane %v102_v15, 4  ;;  %v106_v21 = vld [vmem:[#allocation5 + $0x28] sm:$0xff]  ;;  %v111_v39 = vrot.slane %v110_v29, 2  ;;  %v270_v58 = vld [vmem:[#allocation10 + $0xe0] sm:$0xff]  ;;  %v148_v62 = vmax.f32 %v146_v42, %v147_v52  ;;  %v125_v63 = vrot.slane %v124_v53, 1  ;;  %v1282_v52 = vld [vmem:[#allocation8 + $0x10] sm:$0xff] }
  0x24   :  { %350 = vmatpush.msra.mxu2 %v328_v5  ;;  %v320_v27 = vld [vmem:[#allocation10 + $0xc8] sm:$0xff]  ;;  %v139_v31 = vrot.slane %v106_v21, 4  ;;  %284 = vmatpush.msra.mxu0 %v273_v28  ;;  %v135_v45 = vrot.slane %v134_v35, 2  ;;  %v131_v0 = vrot.slane %v130_v54, 1  ;;  %v154_v2 = vmax.f32 %v152_v46, %v153_v56  ;;  %v269_v4 = vld [vmem:[#allocation10 + $0xc0] sm:$0xff] }
  0x25   :  { %v116_v30 = vmax.f32 %v102_v15, %v115_v20  ;;  %v318_v37 = vld [vmem:[#allocation10 + $0xa8] sm:$0xff]  ;;  %v112_v49 = vmax.f32 %v110_v29, %v111_v39  ;;  %v126_v9 = vmax.f32 %v124_v53, %v125_v63  ;;  %v268_v14 = vld [vmem:[#allocation10 + $0xa0] sm:$0xff] }
  0x26   :  { %351 = vmatpush.msra.mxu2 %v326_v8  ;;  %v140_v41 = vmax.f32 %v106_v21, %v139_v31  ;;  %v316_v47 = vld [vmem:[#allocation10 + $0x88] sm:$0xff]  ;;  %285 = vmatpush.msra.mxu0 %v272_v38  ;;  %v136_v55 = vmax.f32 %v134_v35, %v135_v45  ;;  %v149_v8 = vrot.slane %v148_v62, 1  ;;  %v155_v12 = vrot.slane %v154_v2, 1  ;;  %v267_v20 = vld [vmem:[#allocation10 + $0x80] sm:$0xff] }
  0x27   :  { %v117_v40 = vrot.slane %v116_v30, 2  ;;  %v314_v57 = vld [vmem:[#allocation10 + $0x68] sm:$0xff]  ;;  %v113_v59 = vrot.slane %v112_v49, 1  ;;  %v1231_v23 = vld [vmem:[#allocation8] sm:$0xff] }
  0x28   :  { %352 = vmatpush.msra.mxu2 %v324_v10  ;;  %v141_v51 = vrot.slane %v140_v41, 2  ;;  %286 = vmatpush.msra.mxu0 %v271_v48  ;;  %v137_v1 = vrot.slane %v136_v55, 1  ;;  %v312_v3 = vld [vmem:[#allocation10 + $0x48] sm:$0xff]  ;;  %v132_v10 = vmax.f32 %v130_v54, %v131_v0  ;;  %v150_v17 = vmax.f32 %v148_v62, %v149_v8  ;;  %v266_v25 = vld [vmem:[#allocation10 + $0x60] sm:$0xff]  ;;  %v1310_v0 = vld [vmem:[#allocation13 + $0x78] sm:$0xff] }
  0x29   :  { %v118_v50 = vmax.f32 %v116_v30, %v117_v40  ;;  %v114_v5 = vmax.f32 %v112_v49, %v113_v59  ;;  %v310_v13 = vld [vmem:[#allocation10 + $0x28] sm:$0xff]  ;;  %v156_v21 = vmax.f32 %v154_v2, %v155_v12  ;;  %v265_v28 = vld [vmem:[#allocation10 + $0x40] sm:$0xff]  ;;  %v1276_v49 = vld [vmem:[#allocation13 + $0xf0] sm:$0xff] }
  0x2a   :  { %353 = vmatpush.msra.mxu2 %v322_v11  ;;  %v142_v61 = vmax.f32 %v140_v41, %v141_v51  ;;  %287 = vmatpush.msra.mxu0 %v270_v58  ;;  %v138_v11 = vmax.f32 %v136_v55, %v137_v1  ;;  %v308_v19 = vld [vmem:[#allocation10 + $0x8] sm:$0xff]  ;;  %v264_v30 = vld [vmem:[#allocation10 + $0x20] sm:$0xff]  ;;  %v1260_v41 = vld [vmem:[#allocation13 + $0x150] sm:$0xff] }
  0x2b   :  { %v119_v60 = vrot.slane %v118_v50, 1  ;;  %v263_v31 = vld [vmem:[#allocation10] sm:$0xff]  ;;  %v1241_v32 = vld [vmem:[#allocation8 + $0x8] sm:$0xff]  ;;  %v1280_v51 = vld [vmem:[#allocation13 + $0xd8] sm:$0xff] }
  0x2c   :  { %354 = vmatpush.msra.mxu2 %v320_v27  ;;  %v143_v7 = vrot.slane %v142_v61, 1  ;;  %288 = vmatpush.msra.mxu0 %v269_v4  ;;  %v1245_v34 = vld [vmem:[#allocation11 + $0x8] ss:$8 sm:$0x3]  ;;  %v1268_v45 = vld [vmem:[#allocation13 + $0x120] sm:$0xff] }
  0x2d   :  { %v120_v6 = vmax.f32 %v118_v50, %v119_v60  ;;  %v1248_v35 = vperm.slane %v1245_v34, 0  ;;  %v1287_v54 = vld [vmem:[#allocation13 + $0xc0] sm:$0xff]  ;;  %v1291_v56 = vld [vmem:[#allocation13 + $0xa8] sm:$0xff]  ;;  %v1298_v59 = vld [vmem:[#allocation13 + $0x90] sm:$0xff] }
  0x2e   :  { %355 = vmatpush.msra.mxu2 %v318_v37  ;;  %v144_v15 = vmax.f32 %v142_v61, %v143_v7  ;;  %289 = vmatpush.msra.mxu0 %v268_v14  ;;  %v1250_v37 = vld [vmem:[#allocation13 + $0x168] sm:$0xff]  ;;  %v1300_v60 = vld [vmem:[#allocation13 + $0x170] sm:$0xff]  ;;  %v1302_v61 = vld [vmem:[#allocation13 + $0x158] sm:$0xff] }
  0x2f   :  { %v166_v16 = vsel %vm165_vm0, %v120_v6, %v114_v5  ;;  %v1305_v62 = vld [vmem:[#allocation13 + $0x140] sm:$0xff]  ;;  %v1312_v1 = vld [vmem:[#allocation13 + $0x128] sm:$0xff]  ;;  %v1315_v2 = vld [vmem:[#allocation13 + $0x110] sm:$0xff] }
  0x30   :  { %356 = vmatpush.msra.mxu2 %v316_v47  ;;  %v168_v18 = vsel %vm167_vm1, %v126_v9, %v166_v16  ;;  %290 = vmatpush.msra.mxu0 %v267_v20  ;;  %v1272_v47 = vld [vmem:[#allocation13 + $0x108] sm:$0xff]  ;;  %v1320_v4 = vld [vmem:[#allocation13 + $0x60] sm:$0xff]  ;;  %v1322_v5 = vld [vmem:[#allocation13 + $0xf8] sm:$0xff] }
  0x31   :  { %v170_v22 = vsel %vm169_vm2, %v132_v10, %v168_v18  ;;  %v1325_v6 = vld [vmem:[#allocation13 + $0xe0] sm:$0xff]  ;;  %v1330_v8 = vld [vmem:[#allocation13 + $0x48] sm:$0xff]  ;;  %v1335_v10 = vld [vmem:[#allocation13 + $0xb0] sm:$0xff] }
  0x32   :  { %357 = vmatpush.msra.mxu2 %v314_v57  ;;  %v172_v24 = vsel %vm171_vm3, %v138_v11, %v170_v22  ;;  %291 = vmatpush.msra.mxu0 %v266_v25  ;;  %v1293_v57 = vld [vmem:[#allocation8 + $0x18] sm:$0xff]  ;;  %v1332_v9 = vld [vmem:[#allocation13 + $0xc8] sm:$0xff]  ;;  %v1340_v12 = vld [vmem:[#allocation13 + $0x30] sm:$0xff] }
  0x33   :  { %v174_v26 = vsel %vm173_vm4, %v144_v15, %v172_v24  ;;  %v1345_v14 = vld [vmem:[#allocation13 + $0x18] sm:$0xff]  ;;  %v1349_v16 = vld [vmem:[#allocation13] sm:$0xff]  ;;  %v1361_v24 = vld [vmem:[#allocation13 + $0x68] sm:$0xff] }
  0x34   :  { %358 = vmatpush.msra.mxu2 %v312_v3  ;;  %v176_v27 = vsel %vm175_vm5, %v150_v17, %v174_v26  ;;  %292 = vmatpush.msra.mxu0 %v265_v28  ;;  %v1351_v17 = vld [vmem:[#allocation11] ss:$0 sm:$0xff]  ;;  %1526 = vst [vmem:[#allocation26_spill] sm:$0xff] %v1361_v24  ;;  %v1364_v25 = vld [vmem:[#allocation13 + $0x50] sm:$0xff] }
  0x35   :  { %v1238_v29 = vsel %vm177_vm6, %v156_v21, %v176_v27  ;;  %v1356_v21 = vld [vmem:[#allocation13 + $0x98] sm:$0xff]  ;;  %v1358_v22 = vld [vmem:[#allocation13 + $0x80] sm:$0xff]  ;;  %1527 = vst [vmem:[#allocation27_spill] sm:$0xff] %v1364_v25  ;;  %v183_v27 = vld [vmem:[#allocation5 + $0x48] sm:$0xff] }
  0x36   :  { %359 = vmatpush.msra.mxu2 %v310_v13  ;;  %1523 = vst [vmem:[#allocation23_spill] sm:$0xff] %v1238_v29  ;;  %293 = vmatpush.msra.mxu0 %v264_v30  ;;  %v182_v26 = vld [vmem:[#allocation5 + $0x40] sm:$0xff]  ;;  %v184_v30 = vld [vmem:[#allocation5 + $0x50] sm:$0xff] }
  0x37   :  { %180 = vst [vmem:[#allocation14] sm:$0xff] %v1238_v29 }
  0x38   :  { %360 = vmatpush.msra.mxu2 %v308_v19  ;;  %294 = vmatpush.msra.mxu0 %v263_v31  ;;  %1524 = vst [vmem:[#allocation24_spill] sm:$0xff] %v1356_v21  ;;  %v190_v31 = vrot.slane %v182_v26, 4 }
  0x39   :  { %361 = vmatmul.f32.vlgmr.msra.gmra.mxu2 %v1231_v23  ;;  %295 = vmatmul.f32.vlgmr.msra.gmra.mxu0 %v1238_v29  ;;  %1525 = vst [vmem:[#allocation25_spill] sm:$0xff] %v1358_v22 }
  0x3a   :  { %521 = vmatpush.msrb.mxu0 %v1300_v60 }
  0x3c   :  { %522 = vmatpush.msrb.mxu0 %v1302_v61 }
  0x3e   :  { %523 = vmatpush.msrb.mxu0 %v1305_v62 }
  0x40   :  { %524 = vmatpush.msrb.mxu0 %v1312_v1 }
  0x41   :  { %364 = vmatmul.f32.gmra.mxu2 %v1241_v32 }
  0x42   :  { %525 = vmatpush.msrb.mxu0 %v1315_v2 }
  0x44   :  { %526 = vmatpush.msrb.mxu0 %v1322_v5 }
  0x46   :  { %527 = vmatpush.msrb.mxu0 %v1325_v6 }
  0x48   :  { %528 = vmatpush.msrb.mxu0 %v1332_v9 }
  0x49   :  { %367 = vmatmul.f32.gmra.mxu2 %v1282_v52 }
  0x4a   :  { %529 = vmatpush.msrb.mxu0 %v1335_v10 }
  0x4c   :  { %530 = vmatpush.msrb.mxu0 %v1356_v21 }
  0x4e   :  { %531 = vmatpush.msrb.mxu0 %v1358_v22 }
  0x50   :  { %532 = vmatpush.msrb.mxu0 %v1361_v24 }
  0x51   :  { %370 = vmatmul.f32.gmra.mxu2 %v1293_v57 }
  0x52   :  { %533 = vmatpush.msrb.mxu0 %v1364_v25 }
  0xb6   :  { %v296_v18 = vpop.f32.mrf.mxu0 }
  0xb7   :  { %v297_v20 = vadd.f32 %v296_v18, %v1351_v17 }
  0xbc   :  { %v362_v33 = vpop.f32.mrf.mxu2 }
  0xbd   :  { %v1256_v39 = vadd.f32 %v362_v33, %v1248_v35  ;;  %v196_v33 = vrot.slane %v183_v27, 4 }
  0xbf   :  { %v446_v42 = vmul.f32 %v1260_v41, %v1256_v39  ;;  %v444_v46 = vmul.f32 %v1268_v45, %v1256_v39  ;;  %v442_v50 = vmul.f32 %v1276_v49, %v1256_v39  ;;  %v440_v55 = vmul.f32 %v1287_v54, %v1256_v39 }
  0xc0   :  { %v438_v63 = vmul.f32 %v1298_v59, %v1256_v39  ;;  %v436_v7 = vmul.f32 %v1320_v4, %v1256_v39  ;;  %v434_v13 = vmul.f32 %v1340_v12, %v1256_v39  ;;  %v432_v19 = vmul.f32 %v1349_v16, %v1256_v39  ;;  %v186_v39 = vld [vmem:[#allocation5 + $0x60] sm:$0xff] }
  0xc4   :  { %v365_v36 = vpop.f32.mrf.mxu2 }
  0xc5   :  { %v1253_v38 = vadd.f32 %v365_v36, %v1248_v35  ;;  %v185_v36 = vld [vmem:[#allocation5 + $0x58] sm:$0xff] }
  0xc7   :  { %v447_v40 = vmul.f32 %v1250_v37, %v1253_v38  ;;  %v445_v44 = vmul.f32 %v1264_v43, %v1253_v38  ;;  %v443_v48 = vmul.f32 %v1272_v47, %v1253_v38  ;;  %v441_v53 = vmul.f32 %v1280_v51, %v1253_v38 }
  0xc8   :  { %v439_v58 = vmul.f32 %v1291_v56, %v1253_v38  ;;  %v437_v3 = vmul.f32 %v1310_v0, %v1253_v38  ;;  %v435_v11 = vmul.f32 %v1330_v8, %v1253_v38  ;;  %v433_v15 = vmul.f32 %v1345_v14, %v1253_v38 }
  0xc9   :  { %480 = vmatpush.xpose.msra.mxu3 %v447_v40  ;;  %v202_v38 = vrot.slane %v184_v30, 4  ;;  %v191_v40 = vmax.f32 %v182_v26, %v190_v31 }
  0xcc   :  { %v368_v28 = vpop.f32.mrf.mxu2 }
  0xcd   :  { %481 = vmatpush.xpose.msra.mxu3 %v446_v42  ;;  %v197_v42 = vmax.f32 %v183_v27, %v196_v33 }
  0xd1   :  { %482 = vmatpush.xpose.msra.mxu3 %v445_v44  ;;  %v208_v44 = vrot.slane %v185_v36, 4 }
  0xd4   :  { %v371_v29 = vpop.f32.mrf.mxu2 }
  0xd5   :  { %483 = vmatpush.xpose.msra.mxu3 %v444_v46  ;;  %v187_v46 = vld [vmem:[#allocation5 + $0x68] sm:$0xff] }
  0xd9   :  { %484 = vmatpush.xpose.msra.mxu3 %v443_v48  ;;  %v203_v48 = vmax.f32 %v184_v30, %v202_v38 }
  0xdd   :  { %485 = vmatpush.xpose.msra.mxu3 %v442_v50  ;;  %v214_v50 = vrot.slane %v186_v39, 4 }
  0xe1   :  { %486 = vmatpush.xpose.msra.mxu3 %v441_v53  ;;  %v188_v53 = vld [vmem:[#allocation5 + $0x70] sm:$0xff] }
  0xe2   :  { %v226_v18 = vrot.slane %v188_v53, 4 }
  0xe4   :  { %v227_v30 = vmax.f32 %v188_v53, %v226_v18  ;;  %v1377_v53 = vld [vmem:[#allocation13 + $0x20] sm:$0xff] }
  0xe5   :  { %487 = vmatpush.xpose.msra.mxu3 %v440_v55  ;;  %v192_v55 = vrot.slane %v191_v40, 2 }
  0xe9   :  { %488 = vmatpush.xpose.msra.mxu3 %v439_v58  ;;  %v198_v58 = vrot.slane %v197_v42, 2 }
  0xed   :  { %489 = vmatpush.xpose.msra.mxu3 %v438_v63  ;;  %v209_v63 = vmax.f32 %v185_v36, %v208_v44 }
  0xef   :  { %v210_v26 = vrot.slane %v209_v63, 2 }
  0xf1   :  { %490 = vmatpush.xpose.msra.mxu3 %v437_v3  ;;  %v220_v3 = vrot.slane %v187_v46, 4  ;;  %v211_v36 = vmax.f32 %v209_v63, %v210_v26 }
  0xf3   :  { %v221_v27 = vmax.f32 %v187_v46, %v220_v3  ;;  %v212_v46 = vrot.slane %v211_v36, 1 }
  0xf5   :  { %491 = vmatpush.xpose.msra.mxu3 %v436_v7  ;;  %v1369_v7 = vadd.f32 %v368_v28, %v1248_v35  ;;  %v222_v44 = vrot.slane %v221_v27, 2  ;;  %v1372_v28 = vadd.f32 %v371_v29, %v1248_v35  ;;  %v1381_v35 = vld [vmem:[#allocation13 + $0x8] sm:$0xff]  ;;  %v213_v3 = vmax.f32 %v211_v36, %v212_v46 }
  0xf7   :  { %v620_v46 = vmul.f32 %v1276_v49, %v1369_v7 }
  0xf9   :  { %492 = vmatpush.xpose.msra.mxu3 %v435_v11  ;;  %v189_v11 = vld [vmem:[#allocation5 + $0x78] sm:$0xff] }
  0xfa   :  { %v232_v38 = vrot.slane %v189_v11, 4 }
  0xfd   :  { %493 = vmatpush.xpose.msra.mxu3 %v434_v13  ;;  %v204_v13 = vrot.slane %v203_v48, 2 }
  0xff   :  { %v205_v31 = vmax.f32 %v203_v48, %v204_v13  ;;  %v223_v48 = vmax.f32 %v221_v27, %v222_v44  ;;  %v623_v44 = vmul.f32 %v1264_v43, %v1372_v28 }
 0x101   :  { %494 = vmatpush.xpose.msra.mxu3 %v433_v15  ;;  %v215_v15 = vmax.f32 %v186_v39, %v214_v50  ;;  %v206_v22 = vrot.slane %v205_v31, 1  ;;  %v228_v39 = vrot.slane %v227_v30, 2  ;;  %v1374_v50 = vld [vmem:[#allocation13 + $0x38] sm:$0xff]  ;;  %v224_v13 = vrot.slane %v223_v48, 1 }
 0x102   :  { %534 = vmatpush.msrb.mxu0 %v1374_v50 }
 0x103   :  { %v216_v33 = vrot.slane %v215_v15, 2  ;;  %v229_v29 = vmax.f32 %v227_v30, %v228_v39  ;;  %v624_v30 = vmul.f32 %v1260_v41, %v1369_v7 }
 0x104   :  { %535 = vmatpush.msrb.mxu0 %v1377_v53 }
 0x105   :  { %495 = vmatpush.xpose.msra.mxu3 %v432_v19  ;;  %v193_v19 = vmax.f32 %v191_v40, %v192_v55  ;;  %v217_v21 = vmax.f32 %v215_v15, %v216_v33  ;;  %v625_v55 = vmul.f32 %v1250_v37, %v1372_v28  ;;  %v233_v15 = vmax.f32 %v189_v11, %v232_v38 }
 0x106   :  { %v230_v18 = vrot.slane %v229_v29, 1  ;;  %536 = vmatpush.msrb.mxu0 %v1381_v35 }
 0x107   :  { %v194_v25 = vrot.slane %v193_v19, 1  ;;  %v218_v63 = vrot.slane %v217_v21, 1  ;;  %v234_v26 = vrot.slane %v233_v15, 2 }
 0x108   :  { %496 = vmatmul.f32.vlgmr.msra.gmra.mxu3 %v297_v20  ;;  %v199_v20 = vmax.f32 %v197_v42, %v198_v58  ;;  %v207_v58 = vmax.f32 %v205_v31, %v206_v22  ;;  %v231_v22 = vmax.f32 %v229_v29, %v230_v18  ;;  %658 = vmatpush.xpose.msra.mxu0 %v625_v55  ;;  %v329_v18 = vld [vmem:[#allocation10 + $0x150] sm:$0xff] }
 0x109   :  { %v195_v40 = vmax.f32 %v193_v19, %v194_v25  ;;  %v235_v33 = vmax.f32 %v233_v15, %v234_v26  ;;  %v618_v55 = vmul.f32 %v1287_v54, %v1369_v7  ;;  %v617_v29 = vmul.f32 %v1291_v56, %v1372_v28  ;;  %v333_v15 = vld [vmem:[#allocation10 + $0x190] sm:$0xff] }
 0x10a   :  { %v200_v24 = vrot.slane %v199_v20, 1  ;;  %v325_v26 = vld [vmem:[#allocation10 + $0x110] sm:$0xff] }
 0x10c   :  { %v201_v42 = vmax.f32 %v199_v20, %v200_v24  ;;  %v219_v24 = vmax.f32 %v217_v21, %v218_v63  ;;  %v225_v20 = vmax.f32 %v223_v48, %v224_v13  ;;  %v236_v21 = vrot.slane %v235_v33, 1  ;;  %659 = vmatpush.xpose.msra.mxu0 %v624_v30  ;;  %v335_v13 = vld [vmem:[#allocation10 + $0x1b0] sm:$0xff] }
 0x10d   :  { %v619_v48 = vmul.f32 %v1280_v51, %v1372_v28  ;;  %v317_v30 = vld [vmem:[#allocation10 + $0x90] sm:$0xff] }
 0x10e   :  { %v246_v25 = vsel %vm165_vm0, %v201_v42, %v195_v40  ;;  %v237_v36 = vmax.f32 %v235_v33, %v236_v21  ;;  %v622_v40 = vmul.f32 %v1268_v45, %v1369_v7  ;;  %v621_v42 = vmul.f32 %v1272_v47, %v1372_v28 }
 0x10f   :  { %v247_v19 = vsel %vm167_vm1, %v207_v58, %v246_v25  ;;  %v339_v58 = vld [vmem:[#allocation10 + $0x1f0] sm:$0xff]  ;;  %v616_v25 = vmul.f32 %v1298_v59, %v1369_v7  ;;  %v613_v33 = vmul.f32 %v1330_v8, %v1372_v28  ;;  %v612_v21 = vmul.f32 %v1340_v12, %v1369_v7 }
 0x110   :  { %v248_v27 = vsel %vm169_vm2, %v213_v3, %v247_v19  ;;  %660 = vmatpush.xpose.msra.mxu0 %v623_v44  ;;  %374 = vmatpush.msrb.mxu2 %v339_v58  ;;  %v337_v3 = vld [vmem:[#allocation10 + $0x1d0] sm:$0xff]  ;;  %v615_v19 = vmul.f32 %v1310_v0, %v1372_v28  ;;  %v611_v44 = vmul.f32 %v1345_v14, %v1372_v28 }
 0x111   :  { %v249_v31 = vsel %vm171_vm3, %v219_v24, %v248_v27  ;;  %v331_v24 = vld [vmem:[#allocation10 + $0x170] sm:$0xff]  ;;  %v614_v27 = vmul.f32 %v1320_v4, %v1369_v7 }
 0x112   :  { %v250_v11 = vsel %vm173_vm4, %v225_v20, %v249_v31  ;;  %375 = vmatpush.msrb.mxu2 %v337_v3  ;;  %v327_v20 = vld [vmem:[#allocation10 + $0x130] sm:$0xff]  ;;  %v474_v3 = vld [vmem:[#allocation13 + $0x100] sm:$0xff] }
 0x113   :  { %v251_v38 = vsel %vm175_vm5, %v231_v22, %v250_v11  ;;  %v323_v22 = vld [vmem:[#allocation10 + $0xf0] sm:$0xff] }
 0x114   :  { %v1396_v39 = vsel %vm177_vm6, %v237_v36, %v251_v38  ;;  %661 = vmatpush.xpose.msra.mxu0 %v622_v40  ;;  %376 = vmatpush.msrb.mxu2 %v335_v13  ;;  %v321_v31 = vld [vmem:[#allocation10 + $0xd0] sm:$0xff] }
 0x115   :  { %254 = vst [vmem:[#allocation14 + $0x8] sm:$0xff] %v1396_v39  ;;  %298 = vmatmul.f32.gmra.mxu0 %v1396_v39  ;;  %v319_v11 = vld [vmem:[#allocation10 + $0xb0] sm:$0xff] }
 0x116   :  { %377 = vmatpush.msrb.mxu2 %v333_v15  ;;  %v315_v38 = vld [vmem:[#allocation10 + $0x70] sm:$0xff]  ;;  %v1435_v15 = vperm.slane %v1245_v34, 1  ;;  %877 = dma.vmem_to_hbm [thread:$0]  %s870_s8, 256, %s872_s29, [#allocation7], %s1153_s9, %s1153_s9, %s1154_s10  }
 0x117   :  { %v313_v36 = vld [vmem:[#allocation10 + $0x50] sm:$0xff] }
 0x118   :  { %662 = vmatpush.xpose.msra.mxu0 %v621_v42  ;;  %378 = vmatpush.msrb.mxu2 %v331_v24  ;;  %v311_v40 = vld [vmem:[#allocation10 + $0x30] sm:$0xff] }
 0x119   :  { %v309_v42 = vld [vmem:[#allocation10 + $0x10] sm:$0xff] }
 0x11a   :  { %379 = vmatpush.msrb.mxu2 %v329_v18 }
 0x11c   :  { %663 = vmatpush.xpose.msra.mxu0 %v620_v46  ;;  %380 = vmatpush.msrb.mxu2 %v327_v20  ;;  %v610_v46 = vmul.f32 %v1349_v16, %v1369_v7 }
 0x11e   :  { %381 = vmatpush.msrb.mxu2 %v325_v26 }
 0x120   :  { %664 = vmatpush.xpose.msra.mxu0 %v619_v48  ;;  %382 = vmatpush.msrb.mxu2 %v323_v22 }
 0x122   :  { %383 = vmatpush.msrb.mxu2 %v321_v31 }
 0x124   :  { %665 = vmatpush.xpose.msra.mxu0 %v618_v55  ;;  %384 = vmatpush.msrb.mxu2 %v319_v11  ;;  %v472_v11 = vld [vmem:[#allocation13 + $0xd0] sm:$0xff] }
 0x126   :  { %385 = vmatpush.msrb.mxu2 %v317_v30 }
 0x128   :  { %666 = vmatpush.xpose.msra.mxu0 %v617_v29  ;;  %386 = vmatpush.msrb.mxu2 %v315_v38 }
 0x12a   :  { %387 = vmatpush.msrb.mxu2 %v313_v36  ;;  %v470_v36 = vld [vmem:[#allocation13 + $0xa0] sm:$0xff] }
 0x12c   :  { %667 = vmatpush.xpose.msra.mxu0 %v616_v25  ;;  %388 = vmatpush.msrb.mxu2 %v311_v40  ;;  %v469_v40 = vld [vmem:[#allocation13 + $0x88] sm:$0xff] }
 0x12e   :  { %389 = vmatpush.msrb.mxu2 %v309_v42 }
 0x12f   :  { %390 = vmatmul.f32.vlgmr.msrb.gmra.mxu2 %v1231_v23  ;;  %v479_v23 = vld [vmem:[#allocation13 + $0x178] sm:$0xff] }
 0x130   :  { %668 = vmatpush.xpose.msra.mxu0 %v615_v19  ;;  %567 = vmatpush.msra.mxu2 %v479_v23 }
 0x131   :  { %745 = vmatpush.msrb.mxu3 %v479_v23  ;;  %v465_v23 = vld [vmem:[#allocation13 + $0x28] sm:$0xff] }
 0x134   :  { %669 = vmatpush.xpose.msra.mxu0 %v614_v27 }
 0x137   :  { %393 = vmatmul.f32.gmra.mxu2 %v1241_v32  ;;  %v478_v32 = vld [vmem:[#allocation13 + $0x160] sm:$0xff] }
 0x138   :  { %670 = vmatpush.xpose.msra.mxu0 %v613_v33  ;;  %568 = vmatpush.msra.mxu2 %v478_v32 }
 0x139   :  { %746 = vmatpush.msrb.mxu3 %v478_v32 }
 0x13c   :  { %671 = vmatpush.xpose.msra.mxu0 %v612_v21  ;;  %v471_v21 = vld [vmem:[#allocation13 + $0xb8] sm:$0xff] }
 0x13f   :  { %396 = vmatmul.f32.gmra.mxu2 %v1282_v52  ;;  %v477_v52 = vld [vmem:[#allocation13 + $0x148] sm:$0xff] }
 0x140   :  { %672 = vmatpush.xpose.msra.mxu0 %v611_v44  ;;  %569 = vmatpush.msra.mxu2 %v477_v52 }
 0x141   :  { %747 = vmatpush.msrb.mxu3 %v477_v52  ;;  %v464_v52 = vld [vmem:[#allocation13 + $0x10] sm:$0xff] }
 0x144   :  { %673 = vmatpush.xpose.msra.mxu0 %v610_v46  ;;  %v468_v46 = vld [vmem:[#allocation13 + $0x70] sm:$0xff] }
 0x147   :  { %399 = vmatmul.f32.gmra.mxu2 %v1293_v57  ;;  %v476_v57 = vld [vmem:[#allocation13 + $0x130] sm:$0xff] }
 0x148   :  { %570 = vmatpush.msra.mxu2 %v476_v57  ;;  %748 = vmatpush.msrb.mxu3 %v476_v57 }
 0x18b   :  { %v497_v63 = vpop.f32.mrf.mxu3 }
 0x18c   :  { %500 = vmax.xlane.f32.xlu0 %v497_v63 }
 0x192   :  { %v299_v29 = vpop.f32.mrf.mxu0 }
 0x193   :  { %v300_v7 = vadd.f32 %v299_v29, %v1351_v17  ;;  %v473_v17 = vld [vmem:[#allocation13 + $0xe8] sm:$0xff]  ;;  %v466_v29 = vld [vmem:[#allocation13 + $0x40] sm:$0xff] }
 0x1b2   :  { %v391_v13 = vpop.f32.mrf.mxu2 }
 0x1b3   :  { %v392_v25 = vadd.f32 %v391_v13, %v1435_v15  ;;  %v783_v13 = vld [vmem:[#allocation10 + $0x1d8] sm:$0xff] }
 0x1b5   :  { %v462_v20 = vmul.f32 %v1260_v41, %v392_v25  ;;  %v460_v27 = vmul.f32 %v1268_v45, %v392_v25  ;;  %v458_v34 = vmul.f32 %v1276_v49, %v392_v25  ;;  %v456_v33 = vmul.f32 %v1287_v54, %v392_v25 }
 0x1b6   :  { %v454_v38 = vmul.f32 %v1298_v59, %v392_v25  ;;  %v452_v42 = vmul.f32 %v1320_v4, %v392_v25  ;;  %v448_v32 = vmul.f32 %v1349_v16, %v392_v25 }
 0x1ba   :  { %v394_v24 = vpop.f32.mrf.mxu2 }
 0x1bb   :  { %v395_v18 = vadd.f32 %v394_v24, %v1435_v15  ;;  %v781_v24 = vld [vmem:[#allocation10 + $0x198] sm:$0xff] }
 0x1bd   :  { %v463_v19 = vmul.f32 %v1250_v37, %v395_v18  ;;  %v461_v26 = vmul.f32 %v1264_v43, %v395_v18  ;;  %v459_v22 = vmul.f32 %v1272_v47, %v395_v18  ;;  %v457_v31 = vmul.f32 %v1280_v51, %v395_v18 }
 0x1be   :  { %v455_v30 = vmul.f32 %v1291_v56, %v395_v18  ;;  %v453_v44 = vmul.f32 %v1310_v0, %v395_v18 }
 0x1bf   :  { %547 = vmatpush.msra.mxu1 %v463_v19  ;;  %v779_v19 = vld [vmem:[#allocation10 + $0x158] sm:$0xff] }
 0x1c1   :  { %548 = vmatpush.msra.mxu1 %v462_v20  ;;  %v775_v20 = vld [vmem:[#allocation10 + $0xd8] sm:$0xff] }
 0x1c3   :  { %549 = vmatpush.msra.mxu1 %v461_v26  ;;  %v773_v26 = vld [vmem:[#allocation10 + $0x98] sm:$0xff] }
 0x1c5   :  { %550 = vmatpush.msra.mxu1 %v460_v27  ;;  %v397_v27 = vpop.f32.mrf.mxu2 }
 0x1c7   :  { %551 = vmatpush.msra.mxu1 %v459_v22  ;;  %v772_v22 = vld [vmem:[#allocation10 + $0x78] sm:$0xff] }
 0x1c9   :  { %552 = vmatpush.msra.mxu1 %v458_v34  ;;  %v771_v34 = vld [vmem:[#allocation10 + $0x58] sm:$0xff] }
 0x1cb   :  { %553 = vmatpush.msra.mxu1 %v457_v31  ;;  %v770_v31 = vld [vmem:[#allocation10 + $0x38] sm:$0xff] }
 0x1cd   :  { %554 = vmatpush.msra.mxu1 %v456_v33  ;;  %v769_v33 = vld [vmem:[#allocation10 + $0x18] sm:$0xff] }
 0x1cf   :  { %555 = vmatpush.msra.mxu1 %v455_v30  ;;  %v398_v30 = vadd.f32 %v397_v27, %v1435_v15 }
 0x1d1   :  { %556 = vmatpush.msra.mxu1 %v454_v38 }
 0x1d3   :  { %557 = vmatpush.msra.mxu1 %v453_v44 }
 0x1d5   :  { %558 = vmatpush.msra.mxu1 %v452_v42 }
 0x1ff   :  { %v501_v48 = vpop.xlane.xlu0 %500 }
 0x200   :  { %v502_v28 = vsub.f32 %v497_v63, %v501_v48  ;;  %v475_v63 = vld [vmem:[#allocation13 + $0x118] sm:$0xff]  ;;  %v451_v48 = vmul.f32 %v1330_v8, %v395_v18 }
 0x201   :  { %571 = vmatpush.msra.mxu2 %v475_v63  ;;  %749 = vmatpush.msrb.mxu3 %v475_v63 }
 0x202   :  { %v503_v55 = vmul.f32 1.442695, %v502_v28  ;;  %v467_v28 = vld [vmem:[#allocation13 + $0x58] sm:$0xff]  ;;  %559 = vmatpush.msra.mxu1 %v451_v48 }
 0x203   :  { %572 = vmatpush.msra.mxu2 %v474_v3  ;;  %750 = vmatpush.msrb.mxu3 %v474_v3 }
 0x204   :  { %936 = vpow2.f32 %v503_v55  ;;  %v450_v55 = vmul.f32 %v1340_v12, %v392_v25  ;;  %v782_v25 = vld [vmem:[#allocation10 + $0x1b8] sm:$0xff] }
 0x205   :  { %573 = vmatpush.msra.mxu2 %v473_v17  ;;  %751 = vmatpush.msrb.mxu3 %v473_v17 }
 0x206   :  { %560 = vmatpush.msra.mxu1 %v450_v55 }
 0x207   :  { %574 = vmatpush.msra.mxu2 %v472_v11  ;;  %752 = vmatpush.msrb.mxu3 %v472_v11  ;;  %v400_v11 = vpop.f32.mrf.mxu2 }
 0x209   :  { %575 = vmatpush.msra.mxu2 %v471_v21  ;;  %753 = vmatpush.msrb.mxu3 %v471_v21  ;;  %v401_v21 = vadd.f32 %v400_v11, %v1435_v15 }
 0x20a   :  { %v1430_v58 = vpop.eup %936 }
 0x20b   :  { %537 = vmatmul.f32.vlgmr.msrb.gmra.mxu0 %v1430_v58  ;;  %576 = vmatpush.msra.mxu2 %v470_v36  ;;  %v641_v38 = vmul.f32 %v1250_v37, %v401_v21  ;;  %v639_v44 = vmul.f32 %v1264_v43, %v401_v21  ;;  %v635_v37 = vmul.f32 %v1280_v51, %v401_v21 }
 0x20c   :  { %754 = vmatpush.msrb.mxu3 %v470_v36  ;;  %v640_v36 = vmul.f32 %v1260_v41, %v398_v30  ;;  %v634_v41 = vmul.f32 %v1287_v54, %v398_v30  ;;  %v633_v43 = vmul.f32 %v1291_v56, %v401_v21  ;;  %v629_v51 = vmul.f32 %v1330_v8, %v401_v21 }
 0x20d   :  { %577 = vmatpush.msra.mxu2 %v469_v40  ;;  %v628_v54 = vmul.f32 %v1340_v12, %v398_v30  ;;  %v627_v56 = vmul.f32 %v1345_v14, %v401_v21 }
 0x20e   :  { %755 = vmatpush.msrb.mxu3 %v469_v40  ;;  %v638_v40 = vmul.f32 %v1268_v45, %v398_v30  ;;  %v632_v45 = vmul.f32 %v1298_v59, %v398_v30  ;;  %v626_v59 = vmul.f32 %v1349_v16, %v398_v30  ;;  %v1163_v16 = vmov 128.0  }
 0x20f   :  { %578 = vmatpush.msra.mxu2 %v468_v46 }
 0x210   :  { %756 = vmatpush.msrb.mxu3 %v468_v46  ;;  %v637_v46 = vmul.f32 %v1272_v47, %v401_v21  ;;  %v631_v47 = vmul.f32 %v1310_v0, %v401_v21 }
 0x211   :  { %579 = vmatpush.msra.mxu2 %v467_v28 }
 0x212   :  { %757 = vmatpush.msrb.mxu3 %v467_v28  ;;  %v636_v28 = vmul.f32 %v1276_v49, %v398_v30  ;;  %v630_v49 = vmul.f32 %v1320_v4, %v398_v30 }
 0x213   :  { %674 = vmatmul.f32.vlgmr.msra.gmra.mxu0 %v300_v7  ;;  %v449_v7 = vmul.f32 %v1345_v14, %v395_v18  ;;  %580 = vmatpush.msra.mxu2 %v466_v29  ;;  %v780_v18 = vld [vmem:[#allocation10 + $0x178] sm:$0xff] }
 0x214   :  { %758 = vmatpush.msrb.mxu3 %v466_v29 }
 0x215   :  { %561 = vmatpush.msra.mxu1 %v449_v7  ;;  %581 = vmatpush.msra.mxu2 %v465_v23 }
 0x216   :  { %759 = vmatpush.msrb.mxu3 %v465_v23  ;;  %v258_v23 = vld [vmem:[#allocation11 + $0x18] ss:$0 sm:$0xff] }
 0x217   :  { %562 = vmatpush.msra.mxu1 %v448_v32  ;;  %582 = vmatpush.msra.mxu2 %v464_v52 }
 0x218   :  { %760 = vmatpush.msrb.mxu3 %v464_v52 }
 0x219   :  { %699 = vmatpush.msrb.mxu1 %v1300_v60  ;;  %v1528_v60 = vld [vmem:[#allocation24_spill] sm:$0xff]  ;;  %725 = vmatpush.msrb.mxu2 %v641_v38 }
 0x21b   :  { %700 = vmatpush.msrb.mxu1 %v1302_v61  ;;  %v1529_v61 = vld [vmem:[#allocation25_spill] sm:$0xff]  ;;  %726 = vmatpush.msrb.mxu2 %v640_v36 }
 0x21d   :  { %701 = vmatpush.msrb.mxu1 %v1305_v62  ;;  %727 = vmatpush.msrb.mxu2 %v639_v44 }
 0x21f   :  { %702 = vmatpush.msrb.mxu1 %v1312_v1  ;;  %v1530_v1 = vld [vmem:[#allocation26_spill] sm:$0xff]  ;;  %728 = vmatpush.msrb.mxu2 %v638_v40 }
 0x221   :  { %703 = vmatpush.msrb.mxu1 %v1315_v2  ;;  %729 = vmatpush.msrb.mxu2 %v637_v46 }
 0x223   :  { %704 = vmatpush.msrb.mxu1 %v1322_v5  ;;  %v1531_v5 = vld [vmem:[#allocation27_spill] sm:$0xff]  ;;  %730 = vmatpush.msrb.mxu2 %v636_v28 }
 0x225   :  { %705 = vmatpush.msrb.mxu1 %v1325_v6  ;;  %731 = vmatpush.msrb.mxu2 %v635_v37 }
 0x227   :  { %706 = vmatpush.msrb.mxu1 %v1332_v9  ;;  %732 = vmatpush.msrb.mxu2 %v634_v41 }
 0x229   :  { %707 = vmatpush.msrb.mxu1 %v1335_v10  ;;  %v784_v10 = vld [vmem:[#allocation10 + $0x1f8] sm:$0xff]  ;;  %733 = vmatpush.msrb.mxu2 %v633_v43 }
 0x22b   :  { %708 = vmatpush.msrb.mxu1 %v1528_v60  ;;  %734 = vmatpush.msrb.mxu2 %v632_v45 }
 0x22d   :  { %709 = vmatpush.msrb.mxu1 %v1529_v61  ;;  %735 = vmatpush.msrb.mxu2 %v631_v47 }
 0x22f   :  { %710 = vmatpush.msrb.mxu1 %v1530_v1  ;;  %736 = vmatpush.msrb.mxu2 %v630_v49 }
 0x231   :  { %711 = vmatpush.msrb.mxu1 %v1531_v5  ;;  %737 = vmatpush.msrb.mxu2 %v629_v51 }
 0x233   :  { %712 = vmatpush.msrb.mxu1 %v1374_v50  ;;  %v778_v50 = vld [vmem:[#allocation10 + $0x138] sm:$0xff]  ;;  %738 = vmatpush.msrb.mxu2 %v628_v54 }
 0x235   :  { %713 = vmatpush.msrb.mxu1 %v1377_v53  ;;  %v777_v53 = vld [vmem:[#allocation10 + $0x118] sm:$0xff]  ;;  %739 = vmatpush.msrb.mxu2 %v627_v56 }
 0x237   :  { %714 = vmatpush.msrb.mxu1 %v1381_v35  ;;  %v774_v35 = vld [vmem:[#allocation10 + $0xb8] sm:$0xff]  ;;  %740 = vmatpush.msrb.mxu2 %v626_v59 }
 0x288   :  { %v538_v57 = vpop.f32.mrf.mxu0 }
 0x289   :  { %v541_v63 = vmax.f32 %v538_v57, 1e-30  ;;  %v1532_v57 = vld [vmem:[#allocation23_spill] sm:$0xff] }
 0x28b   :  { %938 = vrcp.f32 %v541_v63 }
 0x290   :  { %v675_v62 = vpop.f32.mrf.mxu0 }
 0x291   :  { %v939_v3 = vpop.eup %938  ;;  %678 = vmax.xlane.f32.xlu0 %v675_v62 }
 0x292   :  { %v543_v2 = vmul.f32 %v939_v3, %v541_v63 }
 0x294   :  { %v544_v6 = vsub.f32 2.0, %v543_v2 }
 0x296   :  { %v545_v17 = vmul.f32 %v939_v3, %v544_v6 }
 0x298   :  { %v546_v9 = vmul.f32 %v1430_v58, %v545_v17  ;;  %v776_v58 = vld [vmem:[#allocation10 + $0xf8] sm:$0xff] }
 0x29a   :  { %563 = vmatmul.f32.vlgmr.msra.gmra.mxu1 %v546_v9  ;;  %583 = vmatmul.f32.vlgmr.msra.gmra.mxu2 %v546_v9 }
 0x29b   :  { %785 = vmatpush.msra.mxu1 %v784_v10 }
 0x29d   :  { %786 = vmatpush.msra.mxu1 %v783_v13 }
 0x29f   :  { %787 = vmatpush.msra.mxu1 %v782_v25 }
 0x2a1   :  { %788 = vmatpush.msra.mxu1 %v781_v24 }
 0x2a3   :  { %789 = vmatpush.msra.mxu1 %v780_v18 }
 0x2a5   :  { %790 = vmatpush.msra.mxu1 %v779_v19 }
 0x2a7   :  { %791 = vmatpush.msra.mxu1 %v778_v50 }
 0x2a9   :  { %792 = vmatpush.msra.mxu1 %v777_v53 }
 0x2ab   :  { %793 = vmatpush.msra.mxu1 %v776_v58 }
 0x2ad   :  { %794 = vmatpush.msra.mxu1 %v775_v20 }
 0x2af   :  { %795 = vmatpush.msra.mxu1 %v774_v35 }
 0x2b1   :  { %796 = vmatpush.msra.mxu1 %v773_v26 }
 0x2b3   :  { %797 = vmatpush.msra.mxu1 %v772_v22 }
 0x2b5   :  { %798 = vmatpush.msra.mxu1 %v771_v34  ;;  %v259_v34 = vld [vmem:[#allocation11 + $0x1] ss:$0 sm:$0xff] }
 0x2b7   :  { %799 = vmatpush.msra.mxu1 %v770_v31 }
 0x2b9   :  { %800 = vmatpush.msra.mxu1 %v769_v33  ;;  %v260_v33 = vld [vmem:[#allocation11 + $0x9] ss:$0 sm:$0xff] }
 0x304   :  { %v679_v42 = vpop.xlane.xlu0 %678 }
 0x305   :  { %v680_v48 = vsub.f32 %v675_v62, %v679_v42 }
 0x307   :  { %v681_v55 = vmul.f32 1.442695, %v680_v48 }
 0x309   :  { %940 = vpow2.f32 %v681_v55 }
 0x30f   :  { %v941_v15 = vpop.eup %940 }
 0x310   :  { %715 = vmatmul.f32.vlgmr.msrb.gmra.mxu1 %v941_v15 }
 0x317   :  { %v564_v29 = vpop.f32.mrf.mxu1 }
 0x318   :  { %801 = vmatmul.f32.vlgmr.msra.gmra.mxu1 %v564_v29 }
 0x31d   :  { %v584_v7 = vpop.f32.mrf.mxu2 }
 0x31e   :  { %588 = vst [vmem:[#allocation17] sm:$0xff] %v584_v7 }
 0x38d   :  { %v716_v0 = vpop.f32.mrf.mxu1 }
 0x38e   :  { %v719_v4 = vmax.f32 %v716_v0, 1e-30 }
 0x390   :  { %942 = vrcp.f32 %v719_v4 }
 0x391   :  { %944 = vrcp.f32 %v1163_v16 }
 0x395   :  { %v802_v8 = vpop.f32.mrf.mxu1 }
 0x396   :  { %v943_v32 = vpop.eup %942  ;;  %v803_v52 = vadd.f32 %v802_v8, %v258_v23 }
 0x397   :  { %v721_v12 = vmul.f32 %v943_v32, %v719_v4  ;;  %v945_v62 = vpop.eup %944 }
 0x398   :  { %v810_v63 = vadd.f32 %v803_v52, %v1532_v57  ;;  %v817_v3 = vmul.f32 128.0, %v945_v62  ;;  %vm821_vm7 = vweird.f32 %v945_v62 }
 0x399   :  { %v722_v60 = vsub.f32 2.0, %v721_v12 }
 0x39a   :  { %812 = vadd.xlane.f32.xlu1 %v810_v63  ;;  %v818_v1 = vsub.f32 1.0, %v817_v3 }
 0x39b   :  { %v723_v14 = vmul.f32 %v943_v32, %v722_v60 }
 0x39c   :  { %v819_v2 = vmul.f32 %v945_v62, %v818_v1 }
 0x39d   :  { %v724_v61 = vmul.f32 %v941_v15, %v723_v14 }
 0x39e   :  { %v820_v5 = vadd.f32 %v945_v62, %v819_v2 }
 0x39f   :  { %741 = vmatmul.f32.vlgmr.msrb.gmra.mxu2 %v724_v61  ;;  %761 = vmatmul.f32.vlgmr.msrb.gmra.mxu3 %v724_v61 }
 0x3a0   :  { %v822_v6 = vsel %vm821_vm7, %v945_v62, %v820_v5 }
 0x40d   :  { %v813_v17 = vpop.xlane.xlu1 %812 }
 0x40e   :  { %v823_v9 = vmul.f32 %v822_v6, %v813_v17 }
 0x410   :  { %v825_v10 = vsub.f32 %v810_v63, %v823_v9 }
 0x412   :  { %v827_v13 = vmul.f32 %v825_v10, %v825_v10 }
 0x414   :  { %829 = vadd.xlane.f32.xlu2 %v827_v13 }
 0x422   :  { %v742_v25 = vpop.f32.mrf.mxu2  ;;  %v762_v24 = vpop.f32.mrf.mxu3 }
 0x423   :  { %766 = vst [vmem:[#allocation17 + $0x8] sm:$0xff] %v762_v24  ;;  %804 = vmatmul.f32.gmra.mxu1 %v742_v25 }
 0x487   :  { %v830_v18 = vpop.xlane.xlu2 %829 }
 0x488   :  { %v833_v19 = vmul.f32 %v830_v18, %v822_v6 }
 0x48a   :  { %v835_v50 = vadd.f32 1e-05, %v833_v19 }
 0x48c   :  { %946 = vrsqrt.f32 %v835_v50  ;;  %vm843_vm9 = vweird.f32 %v835_v50 }
 0x492   :  { %v947_v53 = vpop.eup %946 }
 0x493   :  { %v838_v58 = vmul.f32 %v947_v53, %v835_v50  ;;  %vm844_vm8 = vweird.f32 %v947_v53 }
 0x494   :  { %vm845_vm10 = vmor %vm843_vm9, %vm844_vm8 }
 0x495   :  { %v839_v20 = vmul.f32 %v947_v53, %v838_v58 }
 0x497   :  { %v840_v35 = vmul.f32 0.5, %v839_v20 }
 0x499   :  { %v841_v26 = vsub.f32 1.5, %v840_v35 }
 0x49b   :  { %v842_v27 = vmul.f32 %v947_v53, %v841_v26 }
 0x49d   :  { %v846_v22 = vsel %vm845_vm10, %v947_v53, %v842_v27 }
 0x49e   :  { %v857_v31 = vmul.f32 %v846_v22, %v825_v10 }
 0x4a0   :  { %v805_v11 = vpop.f32.mrf.mxu1  ;;  %v859_v30 = vmul.f32 %v857_v31, %v259_v34 }
 0x4a1   :  { %v806_v21 = vadd.f32 %v805_v11, %v258_v23 }
 0x4a2   :  { %v861_v38 = vadd.f32 %v859_v30, %v260_v33 }
 0x4a3   :  { %v811_v36 = vadd.f32 %v806_v21, %v1396_v39 }
 0x4a4   :  { %863 = vst [vmem:[#allocation15] sm:$0xff] %v861_v38 }
 0x4a5   :  { %814 = vadd.xlane.f32.xlu1 %v811_v36 }
 0x518   :  { %v815_v44 = vpop.xlane.xlu1 %814 }
 0x519   :  { %v824_v40 = vmul.f32 %v822_v6, %v815_v44 }
 0x51b   :  { %v826_v42 = vsub.f32 %v811_v36, %v824_v40 }
 0x51d   :  { %v828_v46 = vmul.f32 %v826_v42, %v826_v42 }
 0x51f   :  { %831 = vadd.xlane.f32.xlu2 %v828_v46 }
 0x592   :  { %v832_v39 = vpop.xlane.xlu2 %831 }
 0x593   :  { %v834_v48 = vmul.f32 %v832_v39, %v822_v6 }
 0x595   :  { %v836_v28 = vadd.f32 1e-05, %v834_v48 }
 0x597   :  { %948 = vrsqrt.f32 %v836_v28  ;;  %vm853_vm12 = vweird.f32 %v836_v28 }
 0x59d   :  { %v949_v55 = vpop.eup %948 }
 0x59e   :  { %v848_v37 = vmul.f32 %v949_v55, %v836_v28  ;;  %vm854_vm11 = vweird.f32 %v949_v55 }
 0x59f   :  { %vm855_vm13 = vmor %vm853_vm12, %vm854_vm11 }
 0x5a0   :  { %v849_v41 = vmul.f32 %v949_v55, %v848_v37 }
 0x5a2   :  { %v850_v43 = vmul.f32 0.5, %v849_v41 }
 0x5a4   :  { %v851_v45 = vsub.f32 1.5, %v850_v43 }
 0x5a6   :  { %v852_v15 = vmul.f32 %v949_v55, %v851_v45 }
 0x5a8   :  { %v856_v47 = vsel %vm855_vm13, %v949_v55, %v852_v15 }
 0x5a9   :  { %v858_v49 = vmul.f32 %v856_v47, %v826_v42 }
 0x5ab   :  { %v860_v51 = vmul.f32 %v858_v49, %v259_v34 }
 0x5ad   :  { %v862_v54 = vadd.f32 %v860_v51, %v260_v33 }
 0x5af   :  { %864 = vst [vmem:[#allocation15 + $0x8] sm:$0xff] %v862_v54 }
 0x5b0   :  { %890 = dma.vmem_to_hbm [thread:$0]  %s883_s11, 256, %s885_s14, [#allocation16], %s1153_s9, %s1153_s9, %s1154_s10  }
 0x5b1   :  { %903 = dma.vmem_to_hbm [thread:$0]  %s896_s15, 256, %s898_s17, [#allocation16], %s1153_s9, %s1153_s9, %s1154_s10  }
 0x5b2   :  { %1148 = dma.done.wait [#allocation7], 256  }
 0x5b3   :  { %1149 = vsyncadd [#allocation7], 4294967040 }
 0x5b4   :  { %1150 = dma.done.wait [#allocation16], 512  }
 0x5b5   :  { %1151 = vsyncadd [#allocation16], 4294966784 }
 0x5b6   :  { %916 = vsyncpa [#allocation6], 1 }
 0x5b7   :  { %917 = vsyncpa [#allocation9], 1 }
 0x5b8   :  { %918 = vsyncpa [#allocation12], 1 }
 0x5b9   :  { %919 = vsyncpa [#allocation7], 1 }
 0x5ba   :  { %920 = vsyncpa [#allocation16], 1 }

</bundles_post_ra>
